<compile_context>
chip_gen: v6e
topology: v6e:2x2x1
jax: 0.10.0
libtpu: 0.0.40
codegen_flags: <defaults>
</compile_context>

<pallas_src>
import jax
import jax.numpy as jnp
from jax import lax
from jax.experimental import pallas as pl
from jax.experimental.pallas import tpu as pltpu

BN_EPS = 1e-5
MATMUL_DTYPE = jnp.bfloat16            # MXU operand dtype (f32 accumulation in-kernel)
ACT_DTYPE = jnp.bfloat16               # inter-layer activation storage dtype
VMEM_LIMIT_BYTES = 32 * 1024 * 1024    # scoped-VMEM request (<= v7x's 64 MiB physical VMEM)
TILE_VMEM_BUDGET = 16 * 1024 * 1024    # soft per-grid-step working-set budget


# ---------------------------------------------------------------------------- kernels -----------

def _conv_acc(x_ref, w_ref):
    """3x3 conv of one fused tile as three row-shifted banded matmuls -> (TH, LP) f32.

    Row r of the tile is one padded image row; output row r needs input rows r-1, r, r+1.
    The shifted copies are built in-register (concat with a zero row); rows whose window would
    cross an image boundary are pad rows and get masked by the caller.
    """
    x = x_ref[...]
    z = jnp.zeros((1, x.shape[1]), x.dtype)
    x_up = jnp.concatenate([z, x[:-1, :]], axis=0)     # row r sees input row r-1  (ki = 0)
    x_dn = jnp.concatenate([x[1:, :], z], axis=0)      # row r sees input row r+1  (ki = 2)
    acc = jnp.dot(x_up, w_ref[0], preferred_element_type=jnp.float32)
    acc = acc + jnp.dot(x, w_ref[1], preferred_element_type=jnp.float32)
    acc = acc + jnp.dot(x_dn, w_ref[2], preferred_element_type=jnp.float32)
    return acc


def _conv_stats_kernel(x_ref, w_ref, b_ref, mask_ref, stats_ref):
    """Pass 1: conv + bias, accumulate global per-lane sum / sum-of-squares across the grid."""
    acc = (_conv_acc(x_ref, w_ref) + b_ref[...]) * mask_ref[...]      # pad rows/lanes -> 0
    part = jnp.concatenate([jnp.sum(acc, axis=0, keepdims=True),
                            jnp.sum(acc * acc, axis=0, keepdims=True)], axis=0)

    @pl.when(pl.program_id(0) == 0)
    def _():
        stats_ref[...] = jnp.zeros_like(stats_ref)

    stats_ref[...] += part


def _conv_bn_relu_kernel(x_ref, w_ref, p_ref, mask_ref, o_ref):
    """Pass 2: recompute conv, apply folded BN affine + ReLU, emit next layer's fused input."""
    p = p_ref[...]                                     # (3, LP): rows = [bias, scale, shift]
    acc = _conv_acc(x_ref, w_ref) + p[0:1, :]
    y = jnp.maximum(acc * p[1:2, :] + p[2:3, :], 0.0) * mask_ref[...]   # zero pad rows for next layer
    o_ref[...] = y.astype(o_ref.dtype)


# --------------------------------------------------------------------------- host glue ----------

def _banded_weights(w_hwio, width):
    """(3,3,Cin,Cout) -> (3, (W+2)*Cin, (W+2)*Cout).  Row ki applies the (kj, channel) part of the
    3x3 stencil to the fused padded-width lane layout; output pad columns (w=0, W+1) are zero."""
    cin = w_hwio.shape[2]
    wp = width + 2
    iw = jnp.arange(1, width + 1)                      # valid output padded-width positions
    mats = []
    for ki in range(3):
        m = jnp.zeros((wp * cin, wp * w_hwio.shape[3]), jnp.float32)
        for kj in range(3):
            sel = jnp.zeros((wp, wp), jnp.float32).at[iw - 1 + kj, iw].set(1.0)
            # kron: [(j)*Cin + c, (w)*Cout + co] = sel[j, w] * W[ki, kj, c, co]
            m = m + jnp.kron(sel, w_hwio[ki, kj])
        mats.append(m)
    return jnp.stack(mats)


def _pick_images_per_tile(n, hp, kp, lp):
    """Whole images per grid step: the largest M the VMEM budget allows (fills the MXU and
    amortizes the ~0.35us/step cost), softly capped so huge batches still keep >=2 grid steps
    for v7x's two TensorCores."""
    bytes_per_row = 8 * kp + 12 * lp   # x dbl-buf + 2 shifted copies (bf16), out dbl-buf, f32 acc/y
    vmem_rows = max(hp, TILE_VMEM_BUDGET // bytes_per_row)
    target = min(vmem_rows, max(512, hp))
    best = 1
    for k in range(1, n + 1):
        if n % k == 0 and k * hp <= target:
            best = k
    # TODO(synk): for very large H*W*C a single image can exceed the soft budget; that case needs
    # sub-image H tiles with DMA'd halos (not required for this module's shapes).
    return best


def conv_bn_relu_fused(x_fused, w_hwio, b, gamma, beta, *, n, h, w, hp, out_dtype):
    """One Conv3x3(SAME) + BatchNorm2d(batch stats) + ReLU block on the fused padded layout.

    x_fused: (N*HP, (W+2)*Cin) with pad rows/cols zero.  Returns the same layout with Cout lanes,
    directly usable as the next layer's input (no relayout between layers)."""
    cin, cout = w_hwio.shape[2], w_hwio.shape[3]
    kp = (w + 2) * cin                         # fused contraction width (padded W, Cin)
    lp = (w + 2) * cout                        # fused output width (padded W, Cout)
    m = n * hp
    k_img = _pick_images_per_tile(n, hp, kp, lp)
    th = k_img * hp                            # rows per grid step (multiple of 8: hp % 8 == 0)
    g = m // th

    wb = _banded_weights(w_hwio, w).astype(MATMUL_DTYPE)              # (3, kp, lp), grid-resident
    lane_w = jnp.arange(lp) // cout
    lane_valid = (lane_w >= 1) & (lane_w <= w)                        # kill pad columns
    bias_row = jnp.where(lane_valid, jnp.tile(b, w + 2), 0.0).reshape(1, lp).astype(jnp.float32)
    row_p = jnp.arange(th) % hp
    row_mask = ((row_p >= 1) & (row_p <= h)).astype(jnp.float32).reshape(th, 1)   # kill pad rows

    x_spec = pl.BlockSpec((th, kp), lambda i: (i, 0))
    w_spec = pl.BlockSpec((3, kp, lp), lambda i: (0, 0, 0))           # resident across the grid
    m_spec = pl.BlockSpec((th, 1), lambda i: (0, 0))

    # ---- pass 1: conv + in-kernel global BN statistics accumulation ------------------------
    stats = pl.pallas_call(
        _conv_stats_kernel,
        out_shape=jax.ShapeDtypeStruct((2, lp), jnp.float32),
        grid=(g,),
        in_specs=[x_spec, w_spec, pl.BlockSpec((1, lp), lambda i: (0, 0)), m_spec],
        out_specs=pl.BlockSpec((2, lp), lambda i: (0, 0)),            # resident accumulator
        compiler_params=pltpu.CompilerParams(
            dimension_semantics=("arbitrary",), vmem_limit_bytes=VMEM_LIMIT_BYTES),
    )(x_fused, wb, bias_row, row_mask)

    # tiny O(Cout) BN affine fold in plain JAX between the two passes
    tot = stats.reshape(2, w + 2, cout).sum(axis=1)                   # pad lanes contribute 0
    count = jnp.float32(n * h * w)
    mean = tot[0] / count
    # TODO(synk): E[x^2]-E[x]^2 can cancel for large-mean/low-variance channels; a shifted/Welford
    # accumulation would be safer.  Post-conv activations here are near zero-mean so f32 is fine.
    var = jnp.maximum(tot[1] / count - mean * mean, 0.0)              # biased var (training BN)
    scale = gamma * lax.rsqrt(var + BN_EPS)
    shift = beta - mean * scale
    params2 = jnp.stack([
        jnp.where(lane_valid, jnp.tile(b, w + 2), 0.0),
        jnp.tile(scale, w + 2),
        jnp.where(lane_valid, jnp.tile(shift, w + 2), 0.0),
    ]).astype(jnp.float32)                                            # one packed (3, lp) input

    # ---- pass 2: recompute conv tile, folded BN + ReLU, write next layer's fused input -----
    out = pl.pallas_call(
        _conv_bn_relu_kernel,
        out_shape=jax.ShapeDtypeStruct((m, lp), out_dtype),
        grid=(g,),
        in_specs=[x_spec, w_spec, pl.BlockSpec((3, lp), lambda i: (0, 0)), m_spec],
        out_specs=pl.BlockSpec((th, lp), lambda i: (i, 0)),
        compiler_params=pltpu.CompilerParams(
            dimension_semantics=("parallel",), vmem_limit_bytes=VMEM_LIMIT_BYTES),
    )(x_fused, wb, params2, row_mask)
    return out


def init_params(key, in_channel, out_channel, conv_num):
    """Deterministic init mimicking PyTorch Conv2d default (uniform +-1/sqrt(fan_in)),
    BatchNorm2d gamma=1, beta=0."""
    params = []
    cin = in_channel
    for _ in range(conv_num):
        key, kw, kb = jax.random.split(key, 3)
        bound = 1.0 / ((cin * 9) ** 0.5)
        wgt = jax.random.uniform(kw, (3, 3, cin, out_channel), jnp.float32, -bound, bound)
        bia = jax.random.uniform(kb, (out_channel,), jnp.float32, -bound, bound)
        params.append((wgt, bia, jnp.ones((out_channel,), jnp.float32),
                       jnp.zeros((out_channel,), jnp.float32)))
        cin = out_channel
    return params


@jax.jit
def downsample_layer(x_nchw, params):
    # External API is NCHW (PyTorch convention).  One relayout into the fused padded layout at
    # the model boundary; all layers then stay in that layout (bf16) end to end.
    n, cin, h, w = x_nchw.shape
    hp = -(-(h + 2) // 8) * 8                 # per-image padded rows, rounded to a sublane multiple
    x = jnp.transpose(x_nchw, (0, 2, 3, 1))
    x = jnp.pad(x, ((0, 0), (1, hp - h - 1), (1, 1), (0, 0)))
    x = x.reshape(n * hp, (w + 2) * cin).astype(ACT_DTYPE)
    for li, (wgt, bia, gamma, beta) in enumerate(params):
        last = li == len(params) - 1
        x = conv_bn_relu_fused(x, wgt, bia, gamma, beta, n=n, h=h, w=w, hp=hp,
                               out_dtype=jnp.float32 if last else ACT_DTYPE)
    cout = params[-1][0].shape[-1]
    y = x.reshape(n, hp, w + 2, cout)[:, 1:h + 1, 1:w + 1, :]
    return jnp.transpose(y, (0, 3, 1, 2)).astype(jnp.float32)


def _reference(x_nchw, params, matmul_dtype=jnp.float32):
    """Pure-JAX reference (XLA conv).  matmul_dtype=bfloat16 matches the kernel's MXU/activation
    rounding so the structural check can be tight."""
    x = jnp.transpose(x_nchw, (0, 2, 3, 1))
    for (wgt, bia, gamma, beta) in params:
        xl = x.astype(matmul_dtype).astype(jnp.float32)
        wl = wgt.astype(matmul_dtype).astype(jnp.float32)
        y = lax.conv_general_dilated(xl, wl, (1, 1), 'SAME',
                                     dimension_numbers=('NHWC', 'HWIO', 'NHWC')) + bia
        mean = jnp.mean(y, axis=(0, 1, 2), keepdims=True)
        var = jnp.mean(jnp.square(y - mean), axis=(0, 1, 2), keepdims=True)
        x = jnp.maximum((y - mean) * lax.rsqrt(var + BN_EPS) * gamma + beta, 0.0)
    return jnp.transpose(x, (0, 3, 1, 2))


if __name__ == "__main__":
    key = jax.random.PRNGKey(0)
    kx, kprm = jax.random.split(key)

    in_channel, out_channel, conv_num = 4, 8, 2
    N, H, W = 2, 16, 16

    x = jax.random.normal(kx, (N, in_channel, H, W), jnp.float32)
    params = init_params(kprm, in_channel, out_channel, conv_num)

    out = downsample_layer(x, params)
    jax.block_until_ready(out)
    assert out.shape == (N, out_channel, H, W), out.shape
    assert bool(jnp.all(jnp.isfinite(out)))

    # Tight structural check: reference with operands/activations rounded the same way (bf16).
    ref_matched = _reference(x, params, matmul_dtype=MATMUL_DTYPE)
    err_m = float(jnp.max(jnp.abs(out - ref_matched)))
    assert err_m < 2e-2, err_m

    # Loose sanity check vs pure-f32 module semantics (bf16 operands/activations dominate diff).
    ref_f32 = _reference(x, params, matmul_dtype=jnp.float32)
    err_f = float(jnp.max(jnp.abs(out - ref_f32)))
    assert err_f < 2e-1, err_f

    print("KERNEL_OK")
</pallas_src>

<mosaic_0001>
module attributes {stable_mosaic.version = 11 : i64} {
  func.func @_conv_stats_kernel(%arg0: i32, %arg1: memref<48x72xbf16, #tpu.memory_space<vmem>>, %arg2: memref<3x72x144xbf16, #tpu.memory_space<vmem>>, %arg3: memref<1x144xf32, #tpu.memory_space<vmem>>, %arg4: memref<48x1xf32, #tpu.memory_space<vmem>>, %arg5: memref<2x144xf32, #tpu.memory_space<vmem>>) attributes {dimension_semantics = [#tpu.dimension_semantics<arbitrary>], iteration_bounds = array<i64: 1>, scalar_prefetch = 0 : i64, scratch_operands = 0 : i64, tpu.core_type = #tpu.core_type<tc>, window_params = [{transform_indices = @transform_0, window_bounds = array<i64: 48, 72>}, {pipeline_mode = #tpu.pipeline_mode<synchronous>, transform_indices = @transform_1, window_bounds = array<i64: 3, 72, 144>}, {pipeline_mode = #tpu.pipeline_mode<synchronous>, transform_indices = @transform_2, window_bounds = array<i64: 1, 144>}, {pipeline_mode = #tpu.pipeline_mode<synchronous>, transform_indices = @transform_3, window_bounds = array<i64: 48, 1>}, {pipeline_mode = #tpu.pipeline_mode<synchronous>, transform_indices = @transform_4, window_bounds = array<i64: 2, 144>}]} {
    %c0 = arith.constant 0 : index
    %c0_0 = arith.constant 0 : index
    %0 = vector.load %arg1[%c0, %c0_0] : memref<48x72xbf16, #tpu.memory_space<vmem>>, vector<48x72xbf16>
    %cst = arith.constant 0.000000e+00 : bf16
    %1 = vector.broadcast %cst : bf16 to vector<1x72xbf16>
    %2 = vector.extract_strided_slice %0 {offsets = [0, 0], sizes = [47, 72], strides = [1, 1]} : vector<48x72xbf16> to vector<47x72xbf16>
    %3 = tpu.concatenate %1, %2 in 0 : vector<1x72xbf16>, vector<47x72xbf16> -> vector<48x72xbf16>
    %4 = vector.extract_strided_slice %0 {offsets = [1, 0], sizes = [47, 72], strides = [1, 1]} : vector<48x72xbf16> to vector<47x72xbf16>
    %5 = tpu.concatenate %4, %1 in 0 : vector<47x72xbf16>, vector<1x72xbf16> -> vector<48x72xbf16>
    %c0_1 = arith.constant 0 : index
    %c0_2 = arith.constant 0 : index
    %c0_3 = arith.constant 0 : index
    %6 = vector.load %arg2[%c0_1, %c0_2, %c0_3] : memref<3x72x144xbf16, #tpu.memory_space<vmem>>, vector<1x72x144xbf16>
    %7 = vector.shape_cast %6 : vector<1x72x144xbf16> to vector<72x144xbf16>
    %cst_4 = arith.constant dense<0.000000e+00> : vector<48x144xf32>
    %8 = tpu.matmul %3, %7, %cst_4 {dimension_numbers = #tpu.dot_dimension_numbers<[1], [0], [0], [1], [0, 0, 1, 1], [], []>} : vector<48x72xbf16>, vector<72x144xbf16>, vector<48x144xf32> -> vector<48x144xf32>
    %c1 = arith.constant 1 : index
    %c0_5 = arith.constant 0 : index
    %c0_6 = arith.constant 0 : index
    %9 = vector.load %arg2[%c1, %c0_5, %c0_6] : memref<3x72x144xbf16, #tpu.memory_space<vmem>>, vector<1x72x144xbf16>
    %10 = vector.shape_cast %9 : vector<1x72x144xbf16> to vector<72x144xbf16>
    %cst_7 = arith.constant dense<0.000000e+00> : vector<48x144xf32>
    %11 = tpu.matmul %0, %10, %cst_7 {dimension_numbers = #tpu.dot_dimension_numbers<[1], [0], [0], [1], [0, 0, 1, 1], [], []>} : vector<48x72xbf16>, vector<72x144xbf16>, vector<48x144xf32> -> vector<48x144xf32>
    %12 = arith.addf %8, %11 : vector<48x144xf32>
    %c2 = arith.constant 2 : index
    %c0_8 = arith.constant 0 : index
    %c0_9 = arith.constant 0 : index
    %13 = vector.load %arg2[%c2, %c0_8, %c0_9] : memref<3x72x144xbf16, #tpu.memory_space<vmem>>, vector<1x72x144xbf16>
    %14 = vector.shape_cast %13 : vector<1x72x144xbf16> to vector<72x144xbf16>
    %cst_10 = arith.constant dense<0.000000e+00> : vector<48x144xf32>
    %15 = tpu.matmul %5, %14, %cst_10 {dimension_numbers = #tpu.dot_dimension_numbers<[1], [0], [0], [1], [0, 0, 1, 1], [], []>} : vector<48x72xbf16>, vector<72x144xbf16>, vector<48x144xf32> -> vector<48x144xf32>
    %16 = arith.addf %12, %15 : vector<48x144xf32>
    %c0_11 = arith.constant 0 : index
    %c0_12 = arith.constant 0 : index
    %17 = vector.load %arg3[%c0_11, %c0_12] : memref<1x144xf32, #tpu.memory_space<vmem>>, vector<1x144xf32>
    %18 = vector.broadcast %17 : vector<1x144xf32> to vector<48x144xf32>
    %19 = arith.addf %16, %18 : vector<48x144xf32>
    %c0_13 = arith.constant 0 : index
    %c0_14 = arith.constant 0 : index
    %20 = vector.load %arg4[%c0_13, %c0_14] : memref<48x1xf32, #tpu.memory_space<vmem>>, vector<48x1xf32>
    %21 = vector.broadcast %20 : vector<48x1xf32> to vector<48x144xf32>
    %22 = arith.mulf %19, %21 : vector<48x144xf32>
    %cst_15 = arith.constant dense<0.000000e+00> : vector<144xf32>
    %23 = vector.multi_reduction <add>, %22, %cst_15 [0] : vector<48x144xf32> to vector<144xf32>
    %24 = vector.shape_cast %23 : vector<144xf32> to vector<1x144xf32>
    %25 = arith.mulf %22, %22 : vector<48x144xf32>
    %cst_16 = arith.constant dense<0.000000e+00> : vector<144xf32>
    %26 = vector.multi_reduction <add>, %25, %cst_16 [0] : vector<48x144xf32> to vector<144xf32>
    %27 = vector.shape_cast %26 : vector<144xf32> to vector<1x144xf32>
    %28 = tpu.concatenate %24, %27 in 0 : vector<1x144xf32>, vector<1x144xf32> -> vector<2x144xf32>
    %c0_i32 = arith.constant 0 : i32
    %29 = arith.cmpi eq, %arg0, %c0_i32 : i32
    %30 = arith.extui %29 : i1 to i32
    %c0_i32_17 = arith.constant 0 : i32
    %31 = arith.cmpi ne, %30, %c0_i32_17 : i32
    scf.if %31 {
      %cst_22 = arith.constant 0.000000e+00 : f32
      %35 = vector.broadcast %cst_22 : f32 to vector<2x144xf32>
      %c0_23 = arith.constant 0 : index
      %c0_24 = arith.constant 0 : index
      %36 = vector.load %arg5[%c0_23, %c0_24] : memref<2x144xf32, #tpu.memory_space<vmem>>, vector<2x144xf32>
      tpu.vector_store %arg5[%c0_23, %c0_24], %35 {strides = array<i32>} : memref<2x144xf32, #tpu.memory_space<vmem>>, vector<2x144xf32>,
    } else {
    }
    %c0_18 = arith.constant 0 : index
    %c0_19 = arith.constant 0 : index
    %32 = vector.load %arg5[%c0_18, %c0_19] : memref<2x144xf32, #tpu.memory_space<vmem>>, vector<2x144xf32>
    %33 = arith.addf %32, %28 : vector<2x144xf32>
    %c0_20 = arith.constant 0 : index
    %c0_21 = arith.constant 0 : index
    %34 = vector.load %arg5[%c0_20, %c0_21] : memref<2x144xf32, #tpu.memory_space<vmem>>, vector<2x144xf32>
    tpu.vector_store %arg5[%c0_20, %c0_21], %33 {strides = array<i32>} : memref<2x144xf32, #tpu.memory_space<vmem>>, vector<2x144xf32>,
    return
  }
  func.func @transform_0(%arg0: i32) -> (i32, i32) {
    %c0_i32 = arith.constant 0 : i32
    %c0_i32_0 = arith.constant 0 : i32
    return %arg0, %c0_i32 : i32, i32
  }
  func.func @transform_1(%arg0: i32) -> (i32, i32, i32) {
    %c0_i32 = arith.constant 0 : i32
    %c0_i32_0 = arith.constant 0 : i32
    %c0_i32_1 = arith.constant 0 : i32
    %c0_i32_2 = arith.constant 0 : i32
    return %c0_i32, %c0_i32_0, %c0_i32_1 : i32, i32, i32
  }
  func.func @transform_2(%arg0: i32) -> (i32, i32) {
    %c0_i32 = arith.constant 0 : i32
    %c0_i32_0 = arith.constant 0 : i32
    %c0_i32_1 = arith.constant 0 : i32
    return %c0_i32, %c0_i32_0 : i32, i32
  }
  func.func @transform_3(%arg0: i32) -> (i32, i32) {
    %c0_i32 = arith.constant 0 : i32
    %c0_i32_0 = arith.constant 0 : i32
    %c0_i32_1 = arith.constant 0 : i32
    return %c0_i32, %c0_i32_0 : i32, i32
  }
  func.func @transform_4(%arg0: i32) -> (i32, i32) {
    %c0_i32 = arith.constant 0 : i32
    %c0_i32_0 = arith.constant 0 : i32
    %c0_i32_1 = arith.constant 0 : i32
    return %c0_i32, %c0_i32_0 : i32, i32
  }
}

module attributes {stable_mosaic.version = 11 : i64} {
  func.func @_conv_bn_relu_kernel(%arg0: i32, %arg1: memref<48x72xbf16, #tpu.memory_space<vmem>>, %arg2: memref<3x72x144xbf16, #tpu.memory_space<vmem>>, %arg3: memref<3x144xf32, #tpu.memory_space<vmem>>, %arg4: memref<48x1xf32, #tpu.memory_space<vmem>>, %arg5: memref<48x144xbf16, #tpu.memory_space<vmem>>) attributes {dimension_semantics = [#tpu.dimension_semantics<parallel>], iteration_bounds = array<i64: 1>, scalar_prefetch = 0 : i64, scratch_operands = 0 : i64, tpu.core_type = #tpu.core_type<tc>, window_params = [{transform_indices = @transform_0, window_bounds = array<i64: 48, 72>}, {pipeline_mode = #tpu.pipeline_mode<synchronous>, transform_indices = @transform_1, window_bounds = array<i64: 3, 72, 144>}, {pipeline_mode = #tpu.pipeline_mode<synchronous>, transform_indices = @transform_2, window_bounds = array<i64: 3, 144>}, {pipeline_mode = #tpu.pipeline_mode<synchronous>, transform_indices = @transform_3, window_bounds = array<i64: 48, 1>}, {transform_indices = @transform_4, window_bounds = array<i64: 48, 144>}]} {
    %c0 = arith.constant 0 : index
    %c0_0 = arith.constant 0 : index
    %0 = vector.load %arg3[%c0, %c0_0] : memref<3x144xf32, #tpu.memory_space<vmem>>, vector<3x144xf32>
    %c0_1 = arith.constant 0 : index
    %c0_2 = arith.constant 0 : index
    %1 = vector.load %arg1[%c0_1, %c0_2] : memref<48x72xbf16, #tpu.memory_space<vmem>>, vector<48x72xbf16>
    %cst = arith.constant 0.000000e+00 : bf16
    %2 = vector.broadcast %cst : bf16 to vector<1x72xbf16>
    %3 = vector.extract_strided_slice %1 {offsets = [0, 0], sizes = [47, 72], strides = [1, 1]} : vector<48x72xbf16> to vector<47x72xbf16>
    %4 = tpu.concatenate %2, %3 in 0 : vector<1x72xbf16>, vector<47x72xbf16> -> vector<48x72xbf16>
    %5 = vector.extract_strided_slice %1 {offsets = [1, 0], sizes = [47, 72], strides = [1, 1]} : vector<48x72xbf16> to vector<47x72xbf16>
    %6 = tpu.concatenate %5, %2 in 0 : vector<47x72xbf16>, vector<1x72xbf16> -> vector<48x72xbf16>
    %c0_3 = arith.constant 0 : index
    %c0_4 = arith.constant 0 : index
    %c0_5 = arith.constant 0 : index
    %7 = vector.load %arg2[%c0_3, %c0_4, %c0_5] : memref<3x72x144xbf16, #tpu.memory_space<vmem>>, vector<1x72x144xbf16>
    %8 = vector.shape_cast %7 : vector<1x72x144xbf16> to vector<72x144xbf16>
    %cst_6 = arith.constant dense<0.000000e+00> : vector<48x144xf32>
    %9 = tpu.matmul %4, %8, %cst_6 {dimension_numbers = #tpu.dot_dimension_numbers<[1], [0], [0], [1], [0, 0, 1, 1], [], []>} : vector<48x72xbf16>, vector<72x144xbf16>, vector<48x144xf32> -> vector<48x144xf32>
    %c1 = arith.constant 1 : index
    %c0_7 = arith.constant 0 : index
    %c0_8 = arith.constant 0 : index
    %10 = vector.load %arg2[%c1, %c0_7, %c0_8] : memref<3x72x144xbf16, #tpu.memory_space<vmem>>, vector<1x72x144xbf16>
    %11 = vector.shape_cast %10 : vector<1x72x144xbf16> to vector<72x144xbf16>
    %cst_9 = arith.constant dense<0.000000e+00> : vector<48x144xf32>
    %12 = tpu.matmul %1, %11, %cst_9 {dimension_numbers = #tpu.dot_dimension_numbers<[1], [0], [0], [1], [0, 0, 1, 1], [], []>} : vector<48x72xbf16>, vector<72x144xbf16>, vector<48x144xf32> -> vector<48x144xf32>
    %13 = arith.addf %9, %12 : vector<48x144xf32>
    %c2 = arith.constant 2 : index
    %c0_10 = arith.constant 0 : index
    %c0_11 = arith.constant 0 : index
    %14 = vector.load %arg2[%c2, %c0_10, %c0_11] : memref<3x72x144xbf16, #tpu.memory_space<vmem>>, vector<1x72x144xbf16>
    %15 = vector.shape_cast %14 : vector<1x72x144xbf16> to vector<72x144xbf16>
    %cst_12 = arith.constant dense<0.000000e+00> : vector<48x144xf32>
    %16 = tpu.matmul %6, %15, %cst_12 {dimension_numbers = #tpu.dot_dimension_numbers<[1], [0], [0], [1], [0, 0, 1, 1], [], []>} : vector<48x72xbf16>, vector<72x144xbf16>, vector<48x144xf32> -> vector<48x144xf32>
    %17 = arith.addf %13, %16 : vector<48x144xf32>
    %18 = vector.extract_strided_slice %0 {offsets = [0, 0], sizes = [1, 144], strides = [1, 1]} : vector<3x144xf32> to vector<1x144xf32>
    %19 = vector.broadcast %18 : vector<1x144xf32> to vector<48x144xf32>
    %20 = arith.addf %17, %19 : vector<48x144xf32>
    %21 = vector.extract_strided_slice %0 {offsets = [1, 0], sizes = [1, 144], strides = [1, 1]} : vector<3x144xf32> to vector<1x144xf32>
    %22 = vector.broadcast %21 : vector<1x144xf32> to vector<48x144xf32>
    %23 = arith.mulf %20, %22 : vector<48x144xf32>
    %24 = vector.extract_strided_slice %0 {offsets = [2, 0], sizes = [1, 144], strides = [1, 1]} : vector<3x144xf32> to vector<1x144xf32>
    %25 = vector.broadcast %24 : vector<1x144xf32> to vector<48x144xf32>
    %26 = arith.addf %23, %25 : vector<48x144xf32>
    %cst_13 = arith.constant 0.000000e+00 : f32
    %27 = vector.broadcast %cst_13 : f32 to vector<48x144xf32>
    %28 = arith.maximumf %26, %27 : vector<48x144xf32>
    %c0_14 = arith.constant 0 : index
    %c0_15 = arith.constant 0 : index
    %29 = vector.load %arg4[%c0_14, %c0_15] : memref<48x1xf32, #tpu.memory_space<vmem>>, vector<48x1xf32>
    %30 = vector.broadcast %29 : vector<48x1xf32> to vector<48x144xf32>
    %31 = arith.mulf %28, %30 : vector<48x144xf32>
    %32 = arith.truncf %31 : vector<48x144xf32> to vector<48x144xbf16>
    %c0_16 = arith.constant 0 : index
    %c0_17 = arith.constant 0 : index
    %33 = vector.load %arg5[%c0_16, %c0_17] : memref<48x144xbf16, #tpu.memory_space<vmem>>, vector<48x144xbf16>
    tpu.vector_store %arg5[%c0_16, %c0_17], %32 {strides = array<i32>} : memref<48x144xbf16, #tpu.memory_space<vmem>>, vector<48x144xbf16>,
    return
  }
  func.func @transform_0(%arg0: i32) -> (i32, i32) {
    %c0_i32 = arith.constant 0 : i32
    %c0_i32_0 = arith.constant 0 : i32
    return %arg0, %c0_i32 : i32, i32
  }
  func.func @transform_1(%arg0: i32) -> (i32, i32, i32) {
    %c0_i32 = arith.constant 0 : i32
    %c0_i32_0 = arith.constant 0 : i32
    %c0_i32_1 = arith.constant 0 : i32
    %c0_i32_2 = arith.constant 0 : i32
    return %c0_i32, %c0_i32_0, %c0_i32_1 : i32, i32, i32
  }
  func.func @transform_2(%arg0: i32) -> (i32, i32) {
    %c0_i32 = arith.constant 0 : i32
    %c0_i32_0 = arith.constant 0 : i32
    %c0_i32_1 = arith.constant 0 : i32
    return %c0_i32, %c0_i32_0 : i32, i32
  }
  func.func @transform_3(%arg0: i32) -> (i32, i32) {
    %c0_i32 = arith.constant 0 : i32
    %c0_i32_0 = arith.constant 0 : i32
    %c0_i32_1 = arith.constant 0 : i32
    return %c0_i32, %c0_i32_0 : i32, i32
  }
  func.func @transform_4(%arg0: i32) -> (i32, i32) {
    %c0_i32 = arith.constant 0 : i32
    %c0_i32_0 = arith.constant 0 : i32
    return %arg0, %c0_i32 : i32, i32
  }
}

module attributes {stable_mosaic.version = 11 : i64} {
  func.func @_conv_stats_kernel(%arg0: i32, %arg1: memref<48x144xbf16, #tpu.memory_space<vmem>>, %arg2: memref<3x144x144xbf16, #tpu.memory_space<vmem>>, %arg3: memref<1x144xf32, #tpu.memory_space<vmem>>, %arg4: memref<48x1xf32, #tpu.memory_space<vmem>>, %arg5: memref<2x144xf32, #tpu.memory_space<vmem>>) attributes {dimension_semantics = [#tpu.dimension_semantics<arbitrary>], iteration_bounds = array<i64: 1>, scalar_prefetch = 0 : i64, scratch_operands = 0 : i64, tpu.core_type = #tpu.core_type<tc>, window_params = [{transform_indices = @transform_0, window_bounds = array<i64: 48, 144>}, {pipeline_mode = #tpu.pipeline_mode<synchronous>, transform_indices = @transform_1, window_bounds = array<i64: 3, 144, 144>}, {pipeline_mode = #tpu.pipeline_mode<synchronous>, transform_indices = @transform_2, window_bounds = array<i64: 1, 144>}, {pipeline_mode = #tpu.pipeline_mode<synchronous>, transform_indices = @transform_3, window_bounds = array<i64: 48, 1>}, {pipeline_mode = #tpu.pipeline_mode<synchronous>, transform_indices = @transform_4, window_bounds = array<i64: 2, 144>}]} {
    %c0 = arith.constant 0 : index
    %c0_0 = arith.constant 0 : index
    %0 = vector.load %arg1[%c0, %c0_0] : memref<48x144xbf16, #tpu.memory_space<vmem>>, vector<48x144xbf16>
    %cst = arith.constant 0.000000e+00 : bf16
    %1 = vector.broadcast %cst : bf16 to vector<1x144xbf16>
    %2 = vector.extract_strided_slice %0 {offsets = [0, 0], sizes = [47, 144], strides = [1, 1]} : vector<48x144xbf16> to vector<47x144xbf16>
    %3 = tpu.concatenate %1, %2 in 0 : vector<1x144xbf16>, vector<47x144xbf16> -> vector<48x144xbf16>
    %4 = vector.extract_strided_slice %0 {offsets = [1, 0], sizes = [47, 144], strides = [1, 1]} : vector<48x144xbf16> to vector<47x144xbf16>
    %5 = tpu.concatenate %4, %1 in 0 : vector<47x144xbf16>, vector<1x144xbf16> -> vector<48x144xbf16>
    %c0_1 = arith.constant 0 : index
    %c0_2 = arith.constant 0 : index
    %c0_3 = arith.constant 0 : index
    %6 = vector.load %arg2[%c0_1, %c0_2, %c0_3] : memref<3x144x144xbf16, #tpu.memory_space<vmem>>, vector<1x144x144xbf16>
    %7 = vector.shape_cast %6 : vector<1x144x144xbf16> to vector<144x144xbf16>
    %cst_4 = arith.constant dense<0.000000e+00> : vector<48x144xf32>
    %8 = tpu.matmul %3, %7, %cst_4 {dimension_numbers = #tpu.dot_dimension_numbers<[1], [0], [0], [1], [0, 0, 1, 1], [], []>} : vector<48x144xbf16>, vector<144x144xbf16>, vector<48x144xf32> -> vector<48x144xf32>
    %c1 = arith.constant 1 : index
    %c0_5 = arith.constant 0 : index
    %c0_6 = arith.constant 0 : index
    %9 = vector.load %arg2[%c1, %c0_5, %c0_6] : memref<3x144x144xbf16, #tpu.memory_space<vmem>>, vector<1x144x144xbf16>
    %10 = vector.shape_cast %9 : vector<1x144x144xbf16> to vector<144x144xbf16>
    %cst_7 = arith.constant dense<0.000000e+00> : vector<48x144xf32>
    %11 = tpu.matmul %0, %10, %cst_7 {dimension_numbers = #tpu.dot_dimension_numbers<[1], [0], [0], [1], [0, 0, 1, 1], [], []>} : vector<48x144xbf16>, vector<144x144xbf16>, vector<48x144xf32> -> vector<48x144xf32>
    %12 = arith.addf %8, %11 : vector<48x144xf32>
    %c2 = arith.constant 2 : index
    %c0_8 = arith.constant 0 : index
    %c0_9 = arith.constant 0 : index
    %13 = vector.load %arg2[%c2, %c0_8, %c0_9] : memref<3x144x144xbf16, #tpu.memory_space<vmem>>, vector<1x144x144xbf16>
    %14 = vector.shape_cast %13 : vector<1x144x144xbf16> to vector<144x144xbf16>
    %cst_10 = arith.constant dense<0.000000e+00> : vector<48x144xf32>
    %15 = tpu.matmul %5, %14, %cst_10 {dimension_numbers = #tpu.dot_dimension_numbers<[1], [0], [0], [1], [0, 0, 1, 1], [], []>} : vector<48x144xbf16>, vector<144x144xbf16>, vector<48x144xf32> -> vector<48x144xf32>
    %16 = arith.addf %12, %15 : vector<48x144xf32>
    %c0_11 = arith.constant 0 : index
    %c0_12 = arith.constant 0 : index
    %17 = vector.load %arg3[%c0_11, %c0_12] : memref<1x144xf32, #tpu.memory_space<vmem>>, vector<1x144xf32>
    %18 = vector.broadcast %17 : vector<1x144xf32> to vector<48x144xf32>
    %19 = arith.addf %16, %18 : vector<48x144xf32>
    %c0_13 = arith.constant 0 : index
    %c0_14 = arith.constant 0 : index
    %20 = vector.load %arg4[%c0_13, %c0_14] : memref<48x1xf32, #tpu.memory_space<vmem>>, vector<48x1xf32>
    %21 = vector.broadcast %20 : vector<48x1xf32> to vector<48x144xf32>
    %22 = arith.mulf %19, %21 : vector<48x144xf32>
    %cst_15 = arith.constant dense<0.000000e+00> : vector<144xf32>
    %23 = vector.multi_reduction <add>, %22, %cst_15 [0] : vector<48x144xf32> to vector<144xf32>
    %24 = vector.shape_cast %23 : vector<144xf32> to vector<1x144xf32>
    %25 = arith.mulf %22, %22 : vector<48x144xf32>
    %cst_16 = arith.constant dense<0.000000e+00> : vector<144xf32>
    %26 = vector.multi_reduction <add>, %25, %cst_16 [0] : vector<48x144xf32> to vector<144xf32>
    %27 = vector.shape_cast %26 : vector<144xf32> to vector<1x144xf32>
    %28 = tpu.concatenate %24, %27 in 0 : vector<1x144xf32>, vector<1x144xf32> -> vector<2x144xf32>
    %c0_i32 = arith.constant 0 : i32
    %29 = arith.cmpi eq, %arg0, %c0_i32 : i32
    %30 = arith.extui %29 : i1 to i32
    %c0_i32_17 = arith.constant 0 : i32
    %31 = arith.cmpi ne, %30, %c0_i32_17 : i32
    scf.if %31 {
      %cst_22 = arith.constant 0.000000e+00 : f32
      %35 = vector.broadcast %cst_22 : f32 to vector<2x144xf32>
      %c0_23 = arith.constant 0 : index
      %c0_24 = arith.constant 0 : index
      %36 = vector.load %arg5[%c0_23, %c0_24] : memref<2x144xf32, #tpu.memory_space<vmem>>, vector<2x144xf32>
      tpu.vector_store %arg5[%c0_23, %c0_24], %35 {strides = array<i32>} : memref<2x144xf32, #tpu.memory_space<vmem>>, vector<2x144xf32>,
    } else {
    }
    %c0_18 = arith.constant 0 : index
    %c0_19 = arith.constant 0 : index
    %32 = vector.load %arg5[%c0_18, %c0_19] : memref<2x144xf32, #tpu.memory_space<vmem>>, vector<2x144xf32>
    %33 = arith.addf %32, %28 : vector<2x144xf32>
    %c0_20 = arith.constant 0 : index
    %c0_21 = arith.constant 0 : index
    %34 = vector.load %arg5[%c0_20, %c0_21] : memref<2x144xf32, #tpu.memory_space<vmem>>, vector<2x144xf32>
    tpu.vector_store %arg5[%c0_20, %c0_21], %33 {strides = array<i32>} : memref<2x144xf32, #tpu.memory_space<vmem>>, vector<2x144xf32>,
    return
  }
  func.func @transform_0(%arg0: i32) -> (i32, i32) {
    %c0_i32 = arith.constant 0 : i32
    %c0_i32_0 = arith.constant 0 : i32
    return %arg0, %c0_i32 : i32, i32
  }
  func.func @transform_1(%arg0: i32) -> (i32, i32, i32) {
    %c0_i32 = arith.constant 0 : i32
    %c0_i32_0 = arith.constant 0 : i32
    %c0_i32_1 = arith.constant 0 : i32
    %c0_i32_2 = arith.constant 0 : i32
    return %c0_i32, %c0_i32_0, %c0_i32_1 : i32, i32, i32
  }
  func.func @transform_2(%arg0: i32) -> (i32, i32) {
    %c0_i32 = arith.constant 0 : i32
    %c0_i32_0 = arith.constant 0 : i32
    %c0_i32_1 = arith.constant 0 : i32
    return %c0_i32, %c0_i32_0 : i32, i32
  }
  func.func @transform_3(%arg0: i32) -> (i32, i32) {
    %c0_i32 = arith.constant 0 : i32
    %c0_i32_0 = arith.constant 0 : i32
    %c0_i32_1 = arith.constant 0 : i32
    return %c0_i32, %c0_i32_0 : i32, i32
  }
  func.func @transform_4(%arg0: i32) -> (i32, i32) {
    %c0_i32 = arith.constant 0 : i32
    %c0_i32_0 = arith.constant 0 : i32
    %c0_i32_1 = arith.constant 0 : i32
    return %c0_i32, %c0_i32_0 : i32, i32
  }
}

module attributes {stable_mosaic.version = 11 : i64} {
  func.func @_conv_bn_relu_kernel(%arg0: i32, %arg1: memref<48x144xbf16, #tpu.memory_space<vmem>>, %arg2: memref<3x144x144xbf16, #tpu.memory_space<vmem>>, %arg3: memref<3x144xf32, #tpu.memory_space<vmem>>, %arg4: memref<48x1xf32, #tpu.memory_space<vmem>>, %arg5: memref<48x144xf32, #tpu.memory_space<vmem>>) attributes {dimension_semantics = [#tpu.dimension_semantics<parallel>], iteration_bounds = array<i64: 1>, scalar_prefetch = 0 : i64, scratch_operands = 0 : i64, tpu.core_type = #tpu.core_type<tc>, window_params = [{transform_indices = @transform_0, window_bounds = array<i64: 48, 144>}, {pipeline_mode = #tpu.pipeline_mode<synchronous>, transform_indices = @transform_1, window_bounds = array<i64: 3, 144, 144>}, {pipeline_mode = #tpu.pipeline_mode<synchronous>, transform_indices = @transform_2, window_bounds = array<i64: 3, 144>}, {pipeline_mode = #tpu.pipeline_mode<synchronous>, transform_indices = @transform_3, window_bounds = array<i64: 48, 1>}, {transform_indices = @transform_4, window_bounds = array<i64: 48, 144>}]} {
    %c0 = arith.constant 0 : index
    %c0_0 = arith.constant 0 : index
    %0 = vector.load %arg3[%c0, %c0_0] : memref<3x144xf32, #tpu.memory_space<vmem>>, vector<3x144xf32>
    %c0_1 = arith.constant 0 : index
    %c0_2 = arith.constant 0 : index
    %1 = vector.load %arg1[%c0_1, %c0_2] : memref<48x144xbf16, #tpu.memory_space<vmem>>, vector<48x144xbf16>
    %cst = arith.constant 0.000000e+00 : bf16
    %2 = vector.broadcast %cst : bf16 to vector<1x144xbf16>
    %3 = vector.extract_strided_slice %1 {offsets = [0, 0], sizes = [47, 144], strides = [1, 1]} : vector<48x144xbf16> to vector<47x144xbf16>
    %4 = tpu.concatenate %2, %3 in 0 : vector<1x144xbf16>, vector<47x144xbf16> -> vector<48x144xbf16>
    %5 = vector.extract_strided_slice %1 {offsets = [1, 0], sizes = [47, 144], strides = [1, 1]} : vector<48x144xbf16> to vector<47x144xbf16>
    %6 = tpu.concatenate %5, %2 in 0 : vector<47x144xbf16>, vector<1x144xbf16> -> vector<48x144xbf16>
    %c0_3 = arith.constant 0 : index
    %c0_4 = arith.constant 0 : index
    %c0_5 = arith.constant 0 : index
    %7 = vector.load %arg2[%c0_3, %c0_4, %c0_5] : memref<3x144x144xbf16, #tpu.memory_space<vmem>>, vector<1x144x144xbf16>
    %8 = vector.shape_cast %7 : vector<1x144x144xbf16> to vector<144x144xbf16>
    %cst_6 = arith.constant dense<0.000000e+00> : vector<48x144xf32>
    %9 = tpu.matmul %4, %8, %cst_6 {dimension_numbers = #tpu.dot_dimension_numbers<[1], [0], [0], [1], [0, 0, 1, 1], [], []>} : vector<48x144xbf16>, vector<144x144xbf16>, vector<48x144xf32> -> vector<48x144xf32>
    %c1 = arith.constant 1 : index
    %c0_7 = arith.constant 0 : index
    %c0_8 = arith.constant 0 : index
    %10 = vector.load %arg2[%c1, %c0_7, %c0_8] : memref<3x144x144xbf16, #tpu.memory_space<vmem>>, vector<1x144x144xbf16>
    %11 = vector.shape_cast %10 : vector<1x144x144xbf16> to vector<144x144xbf16>
    %cst_9 = arith.constant dense<0.000000e+00> : vector<48x144xf32>
    %12 = tpu.matmul %1, %11, %cst_9 {dimension_numbers = #tpu.dot_dimension_numbers<[1], [0], [0], [1], [0, 0, 1, 1], [], []>} : vector<48x144xbf16>, vector<144x144xbf16>, vector<48x144xf32> -> vector<48x144xf32>
    %13 = arith.addf %9, %12 : vector<48x144xf32>
    %c2 = arith.constant 2 : index
    %c0_10 = arith.constant 0 : index
    %c0_11 = arith.constant 0 : index
    %14 = vector.load %arg2[%c2, %c0_10, %c0_11] : memref<3x144x144xbf16, #tpu.memory_space<vmem>>, vector<1x144x144xbf16>
    %15 = vector.shape_cast %14 : vector<1x144x144xbf16> to vector<144x144xbf16>
    %cst_12 = arith.constant dense<0.000000e+00> : vector<48x144xf32>
    %16 = tpu.matmul %6, %15, %cst_12 {dimension_numbers = #tpu.dot_dimension_numbers<[1], [0], [0], [1], [0, 0, 1, 1], [], []>} : vector<48x144xbf16>, vector<144x144xbf16>, vector<48x144xf32> -> vector<48x144xf32>
    %17 = arith.addf %13, %16 : vector<48x144xf32>
    %18 = vector.extract_strided_slice %0 {offsets = [0, 0], sizes = [1, 144], strides = [1, 1]} : vector<3x144xf32> to vector<1x144xf32>
    %19 = vector.broadcast %18 : vector<1x144xf32> to vector<48x144xf32>
    %20 = arith.addf %17, %19 : vector<48x144xf32>
    %21 = vector.extract_strided_slice %0 {offsets = [1, 0], sizes = [1, 144], strides = [1, 1]} : vector<3x144xf32> to vector<1x144xf32>
    %22 = vector.broadcast %21 : vector<1x144xf32> to vector<48x144xf32>
    %23 = arith.mulf %20, %22 : vector<48x144xf32>
    %24 = vector.extract_strided_slice %0 {offsets = [2, 0], sizes = [1, 144], strides = [1, 1]} : vector<3x144xf32> to vector<1x144xf32>
    %25 = vector.broadcast %24 : vector<1x144xf32> to vector<48x144xf32>
    %26 = arith.addf %23, %25 : vector<48x144xf32>
    %cst_13 = arith.constant 0.000000e+00 : f32
    %27 = vector.broadcast %cst_13 : f32 to vector<48x144xf32>
    %28 = arith.maximumf %26, %27 : vector<48x144xf32>
    %c0_14 = arith.constant 0 : index
    %c0_15 = arith.constant 0 : index
    %29 = vector.load %arg4[%c0_14, %c0_15] : memref<48x1xf32, #tpu.memory_space<vmem>>, vector<48x1xf32>
    %30 = vector.broadcast %29 : vector<48x1xf32> to vector<48x144xf32>
    %31 = arith.mulf %28, %30 : vector<48x144xf32>
    %c0_16 = arith.constant 0 : index
    %c0_17 = arith.constant 0 : index
    %32 = vector.load %arg5[%c0_16, %c0_17] : memref<48x144xf32, #tpu.memory_space<vmem>>, vector<48x144xf32>
    tpu.vector_store %arg5[%c0_16, %c0_17], %31 {strides = array<i32>} : memref<48x144xf32, #tpu.memory_space<vmem>>, vector<48x144xf32>,
    return
  }
  func.func @transform_0(%arg0: i32) -> (i32, i32) {
    %c0_i32 = arith.constant 0 : i32
    %c0_i32_0 = arith.constant 0 : i32
    return %arg0, %c0_i32 : i32, i32
  }
  func.func @transform_1(%arg0: i32) -> (i32, i32, i32) {
    %c0_i32 = arith.constant 0 : i32
    %c0_i32_0 = arith.constant 0 : i32
    %c0_i32_1 = arith.constant 0 : i32
    %c0_i32_2 = arith.constant 0 : i32
    return %c0_i32, %c0_i32_0, %c0_i32_1 : i32, i32, i32
  }
  func.func @transform_2(%arg0: i32) -> (i32, i32) {
    %c0_i32 = arith.constant 0 : i32
    %c0_i32_0 = arith.constant 0 : i32
    %c0_i32_1 = arith.constant 0 : i32
    return %c0_i32, %c0_i32_0 : i32, i32
  }
  func.func @transform_3(%arg0: i32) -> (i32, i32) {
    %c0_i32 = arith.constant 0 : i32
    %c0_i32_0 = arith.constant 0 : i32
    %c0_i32_1 = arith.constant 0 : i32
    return %c0_i32, %c0_i32_0 : i32, i32
  }
  func.func @transform_4(%arg0: i32) -> (i32, i32) {
    %c0_i32 = arith.constant 0 : i32
    %c0_i32_0 = arith.constant 0 : i32
    return %arg0, %c0_i32 : i32, i32
  }
}

</mosaic_0001>

<bundles_post_ra>
// kernel: tile.48
= control target key start
LH: loop header
LB: loop body
LE: loop exit
PB: predicated region body
PF: predicated region fallthrough
CT: control target
= control target key end

     0   :  { %s34_s0 = inlined_call_operand.vmem [shape: f32[8], index: 0, kind: input, shape index: {}]   ;;  %s35_s1 = inlined_call_operand.vmem [shape: f32[18,8], index: 1, kind: output, shape index: {}]  }
   0x1   :  { %v4_v0 = vld [vmem:[%s34_s0] ss:$0 sm:$0xff] }
   0x2   :  { %5 = vst [vmem:[%s35_s1] sm:$0xff] %v4_v0  ;;  %10 = vst [vmem:[%s35_s1 + $0x8] sm:$0xff] %v4_v0 }
   0x3   :  { %11 = vst [vmem:[%s35_s1 + $0x10] sm:$0xff] %v4_v0 }

// kernel: downsample_layer.4
= control target key start
LH: loop header
LB: loop body
LE: loop exit
PB: predicated region body
PF: predicated region fallthrough
CT: control target
= control target key end

     0   :  { %vm151_vm0 = vcmask 1043456   ;;  %v785_v2 = vmov 0   ;;  %vm39_vm1 = vsmask.f32 256  ;;  %vm64_vm2 = vcmask 1040384   ;;  %s1040_s1 = inlined_call_operand.vmem [shape: bf16[3,72,144], index: 1, kind: input, shape index: {}]   ;;  %s1041_s0 = inlined_call_operand.vmem [shape: bf16[48,72], index: 0, kind: input, shape index: {}]   ;;  %s1042_s3 = inlined_call_operand.vmem [shape: f32[48,1], index: 3, kind: input, shape index: {}]   ;;  %s1043_s4 = inlined_call_operand.vmem [shape: f32[2,144], index: 4, kind: output, shape index: {}]   ;;  %s1044_s2 = inlined_call_operand.vmem [shape: f32[1,144], index: 2, kind: input, shape index: {}]  }
   0x1   :  { %v673_v0 = vld [vmem:[%s1040_s1 + $0x88] sm:$0xff]  ;;  %v88_v1 = vld [vmem:[%s1040_s1 + $0x40] sm:$0xff]  ;;  %190 = vmatprep.mubr.bf16.mxu0 %v785_v2  ;;  %313 = vmatprep.mubr.bf16.mxu1 %v785_v2  ;;  %v746_v8 = vld [vmem:[%s1040_s1 + $0x34] ss:$8 sps:$4 sm:$0xff]   ;;  %vm144_vm4 = vcmask 588800   ;;  %vm77_vm6 = vcmask 1047552  }
   0x2   :  { %v683_v3 = vcombine.high %v673_v0, %v673_v0  ;;  %v697_v4 = vcombine.high %v88_v1, %v88_v1  ;;  %v682_v5 = vcombine.low %v673_v0, %v673_v0  ;;  %v696_v6 = vcombine.low %v88_v1, %v88_v1  ;;  %v744_v7 = vld [vmem:[%s1040_s1 + $0x7c] ss:$8 sps:$4 sm:$0xff]   ;;  %738 = vset.pattern.permute.xlu0 %v785_v2  ;;  %v748_v11 = vld [vmem:[%s1040_s1 + $0x78] ss:$8 sps:$4 sm:$0xff]   ;;  %v750_v13 = vld [vmem:[%s1040_s1 + $0x6c] ss:$8 sps:$4 sm:$0xff]  }
   0x3   :  { %739 = vset.pattern.permute.xlu1 %v785_v2  ;;  %v749_v12 = vld [vmem:[%s1040_s1 + $0x30] ss:$8 sps:$4 sm:$0xff]   ;;  %v752_v14 = vld [vmem:[%s1040_s1 + $0x24] ss:$8 sps:$4 sm:$0xff]   ;;  %v755_v16 = vld [vmem:[%s1040_s1 + $0x20] ss:$8 sps:$4 sm:$0xff]  }
   0x4   :  { %684 = vmatprep.subr.msk.bf16.mxu0 %vm151_vm0, %v683_v3  ;;  %698 = vmatprep.subr.msk.bf16.mxu1 %vm151_vm0, %v697_v4  ;;  %v153_v9 = vsel %vm151_vm0, %v682_v5, 0  ;;  %v276_v10 = vsel %vm151_vm0, %v696_v6, 0  ;;  %v754_v15 = vld [vmem:[%s1040_s1 + $0x68] ss:$8 sps:$4 sm:$0xff]   ;;  %v756_v17 = vld [vmem:[%s1040_s1 + $0x5c] ss:$8 sps:$4 sm:$0xff]   ;;  %vm894_vm3 = vmand %vm64_vm2, %vm39_vm1 }
   0x5   :  { %165 = vmatpush1.bf16.msra.mxu0 %v153_v9  ;;  %288 = vmatpush1.bf16.msra.mxu1 %v276_v10  ;;  %v758_v18 = vld [vmem:[%s1040_s1 + $0x14] ss:$8 sps:$4 sm:$0xff]   ;;  %v760_v19 = vld [vmem:[%s1040_s1 + $0x58] ss:$8 sps:$4 sm:$0xff]   ;;  %v764_v23 = vld [vmem:[%s1040_s1 + $0x4] ss:$8 sps:$4 sm:$0xff]  }
   0x6   :  { %166 = vmatprep.subr.bf16.mxu0 %v744_v7  ;;  %289 = vmatprep.subr.bf16.mxu1 %v746_v8  ;;  %v761_v20 = vld [vmem:[%s1040_s1 + $0x10] ss:$8 sps:$4 sm:$0xff]   ;;  %v762_v21 = vld [vmem:[%s1040_s1 + $0x4c] ss:$8 sps:$4 sm:$0xff]   ;;  %v869_v22 = vld [vmem:[%s1041_s0] sm:$0xff]   ;;  %vm637_vm8 = vcmask 1041408  }
   0x7   :  { %v766_v24 = vld [vmem:[%s1040_s1 + $0x48] ss:$8 sps:$4 sm:$0xff]   ;;  %v41_v25 = vshrl.u32 %v869_v22, 16  ;;  %v44_v26 = vshll.u32 %v869_v22, 16  ;;  %v773_v41 = vld [vmem:[%s1040_s1 + $0xc4] ss:$8 sps:$4 sm:$0xff]  }
   0x8   :  { %v710_v27 = vld [vmem:[%s1040_s1 + $0xd0] sm:$0xff]  ;;  %v885_v28 = vld [vmem:[%s1041_s0 + $0x8] sm:$0xff]   ;;  %v513_v42 = vld [vmem:[%s1042_s3] sm:$0xff]  ;;  %vm67_vm5 = vsmask.f32 7424  ;;  %vm638_vm9 = vcmask 125954  }
   0x9   :  { %167 = vmatpush1.bf16.msra.mxu0 %v748_v11  ;;  %290 = vmatpush1.bf16.msra.mxu1 %v749_v12  ;;  %v767_v29 = vld [vmem:[%s1040_s1] ss:$8 sps:$4 sm:$0xff]   ;;  %v43_v30 = vrot.slane %v41_v25, 7  ;;  %v720_v32 = vcombine.high %v710_v27, %v710_v27  ;;  %v719_v33 = vcombine.low %v710_v27, %v710_v27  ;;  %v48_v34 = vshrl.u32 %v885_v28, 16  ;;  %v909_v39 = vld [vmem:[%s1041_s0 + $0x10] sm:$0xff]   ;;  %v516_v48 = vld [vmem:[%s1042_s3 + $0x18] sm:$0xff] }
   0xa   :  { %168 = vmatprep.subr.bf16.mxu0 %v750_v13  ;;  %291 = vmatprep.subr.bf16.mxu1 %v752_v14  ;;  %v51_v38 = vshll.u32 %v885_v28, 16  ;;  %v515_v43 = vld [vmem:[%s1042_s3 + $0x10] sm:$0xff]  ;;  %v771_v44 = vld [vmem:[%s1040_s1 + $0xc0] ss:$8 sps:$4 sm:$0xff]   ;;  %v56_v46 = vshrl.u32 %v909_v39, 16  ;;  %v59_v53 = vshll.u32 %v909_v39, 16  ;;  %vm78_vm7 = vmand %vm77_vm6, %vm67_vm5 }
   0xb   :  { %v46_v35 = vor.u32 %v44_v26, %v43_v30  ;;  %v50_v37 = vrot.slane %v48_v34, 7  ;;  %v409_v40 = vsel %vm151_vm0, %v719_v33, 0  ;;  %521 = vperm.xlu0 %738, %v513_v42   ;;  %531 = vperm.xlu1 %739, %v515_v43   ;;  %v514_v47 = vld [vmem:[%s1042_s3 + $0x8] sm:$0xff]  ;;  %v777_v49 = vld [vmem:[%s1040_s1 + $0xb4] ss:$8 sps:$4 sm:$0xff]   ;;  %v517_v57 = vld [vmem:[%s1042_s3 + $0x20] sm:$0xff] }
   0xc   :  { %v775_v51 = vld [vmem:[%s1040_s1 + $0xb0] ss:$8 sps:$4 sm:$0xff]   ;;  %v58_v52 = vrot.slane %v56_v46, 7  ;;  %v780_v54 = vld [vmem:[%s1040_s1 + $0xa4] ss:$8 sps:$4 sm:$0xff]   ;;  %v68_v60 = vrot.slane %v44_v26, 1  ;;  %vm985_vm10 = vmor %vm638_vm9, %vm637_vm8 }
   0xd   :  { %169 = vmatpush1.bf16.msra.mxu0 %v754_v15  ;;  %292 = vmatpush1.bf16.msra.mxu1 %v755_v16  ;;  %v66_v36 = vsel %vm894_vm3, 0, %v46_v35  ;;  %v53_v45 = vor.u32 %v51_v38, %v50_v37  ;;  %v778_v55 = vld [vmem:[%s1040_s1 + $0xa0] ss:$8 sps:$4 sm:$0xff]   ;;  %v784_v59 = vld [vmem:[%s1040_s1 + $0x94] ss:$8 sps:$4 sm:$0xff]   ;;  %v70_v61 = vrot.slane %v51_v38, 1 }
   0xe   :  { %170 = vmatprep.subr.bf16.mxu0 %v756_v17  ;;  %293 = vmatprep.subr.bf16.mxu1 %v758_v18  ;;  %v61_v56 = vor.u32 %v59_v53, %v58_v52  ;;  %v518_v58 = vld [vmem:[%s1042_s3 + $0x28] sm:$0xff]  ;;  %v782_v63 = vld [vmem:[%s1040_s1 + $0x90] ss:$8 sps:$4 sm:$0xff]   ;;  %v69_v0 = vor.u32 %v68_v60, %v41_v25  ;;  %v73_v1 = vrot.slane %v59_v53, 1  ;;  %v786_v9 = vmov 0.0  }
   0xf   :  { %526 = vperm.xlu0 %738, %v514_v47   ;;  %536 = vperm.xlu1 %739, %v516_v48   ;;  %v54_v50 = vsel %vm39_vm1, %v43_v30, %v53_v45  ;;  %v72_v3 = vor.u32 %v70_v61, %v48_v34  ;;  %640 = vst.msk [vmem:[%s1043_s4] sm:$0xf] %vm985_vm10, %v786_v9  ;;  %v489_v34 = vld [vmem:[%s1044_s2] sm:$0x3]  ;;  %vm572_vm11 = vcmask 130048  }
  0x10   :  { %v62_v62 = vsel %vm39_vm1, %v50_v37, %v61_v56  ;;  %v71_v4 = vsel %vm67_vm5, %v69_v0, %v70_v61  ;;  %v75_v6 = vor.u32 %v73_v1, %v56_v46 }
  0x11   :  { %171 = vmatpush1.bf16.msra.mxu0 %v760_v19  ;;  %294 = vmatpush1.bf16.msra.mxu1 %v761_v20  ;;  %v74_v5 = vsel %vm67_vm5, %v72_v3, %v73_v1 }
  0x12   :  { %172 = vmatprep.subr.bf16.mxu0 %v762_v21  ;;  %295 = vmatprep.subr.bf16.mxu1 %v764_v23  ;;  %v79_v7 = vsel %vm78_vm7, %v75_v6, 0  ;;  %v491_v21 = vlaneseq }
  0x13   :  { %541 = vperm.xlu0 %738, %v517_v57   ;;  %546 = vperm.xlu1 %739, %v518_v58  }
  0x14   :  { %v994_v26 = vshrl.u32 %v491_v21, 7 }
  0x15   :  { %173 = vmatpush1.bf16.msra.mxu0 %v766_v24  ;;  %296 = vmatpush1.bf16.msra.mxu1 %v767_v29 }
  0x16   :  { %721 = vmatprep.subr.msk.bf16.mxu0 %vm151_vm0, %v720_v32  ;;  %725 = vmatprep.subr.msk.bf16.mxu1 %vm151_vm0, %v720_v32  ;;  %v493_v31 = vsub.s32 0, %v994_v26  ;;  %v497_v35 = vsub.s32 1, %v994_v26 }
  0x18   :  { %685 = vmatmul.mubr.msk.bf16.vlgmr.msra.gmra.mxu0 %vm144_vm4, %v869_v22  ;;  %699 = vmatmul.mubr.msk.bf16.vlgmr.msra.gmra.mxu1 %vm144_vm4, %v66_v36  ;;  %v1003_v43 = vrot.slane %v489_v34, %v497_v35 }
  0x19   :  { %421 = vmatpush1.bf16.msra.mxu0 %v409_v40  ;;  %730 = vmatpush1.bf16.msra.mxu1 %v409_v40  ;;  %v1001_v40 = vrot.slane %v489_v34, %v493_v31 }
  0x1a   :  { %422 = vmatprep.subr.bf16.mxu0 %v773_v41  ;;  %726 = vmatprep.subr.bf16.mxu1 %v773_v41 }
  0x1b   :  { %200 = vmatprep.mubr.bf16.mxu0 %v785_v2  ;;  %323 = vmatprep.mubr.bf16.mxu1 %v785_v2 }
  0x1d   :  { %423 = vmatpush1.bf16.msra.mxu0 %v771_v44  ;;  %731 = vmatpush1.bf16.msra.mxu1 %v771_v44 }
  0x1e   :  { %424 = vmatprep.subr.bf16.mxu0 %v777_v49  ;;  %727 = vmatprep.subr.bf16.mxu1 %v777_v49 }
  0x20   :  { %686 = vmatmul.mubr.msk.bf16.gmra.mxu0 %vm144_vm4, %v885_v28  ;;  %700 = vmatmul.mubr.msk.bf16.gmra.mxu1 %vm144_vm4, %v54_v50 }
  0x21   :  { %425 = vmatpush1.bf16.msra.mxu0 %v775_v51  ;;  %732 = vmatpush1.bf16.msra.mxu1 %v775_v51 }
  0x22   :  { %210 = vmatprep.mubr.bf16.mxu0 %v785_v2  ;;  %333 = vmatprep.mubr.bf16.mxu1 %v785_v2 }
  0x23   :  { %426 = vmatprep.subr.bf16.mxu0 %v780_v54  ;;  %728 = vmatprep.subr.bf16.mxu1 %v780_v54 }
  0x25   :  { %427 = vmatpush1.bf16.msra.mxu0 %v778_v55  ;;  %733 = vmatpush1.bf16.msra.mxu1 %v778_v55 }
  0x26   :  { %428 = vmatprep.subr.bf16.mxu0 %v784_v59  ;;  %729 = vmatprep.subr.bf16.mxu1 %v784_v59 }
  0x28   :  { %687 = vmatmul.mubr.msk.bf16.gmra.mxu0 %vm144_vm4, %v909_v39  ;;  %701 = vmatmul.mubr.msk.bf16.gmra.mxu1 %vm144_vm4, %v62_v62 }
  0x29   :  { %429 = vmatpush1.bf16.msra.mxu0 %v782_v63  ;;  %734 = vmatpush1.bf16.msra.mxu1 %v782_v63 }
  0x2a   :  { %446 = vmatprep.mubr.bf16.mxu0 %v785_v2  ;;  %456 = vmatprep.mubr.bf16.mxu1 %v785_v2 }
  0x30   :  { %722 = vmatmul.mubr.msk.bf16.vlgmr.msra.gmra.mxu0 %vm144_vm4, %v71_v4  ;;  %723 = vmatmul.mubr.msk.bf16.vlgmr.msra.gmra.mxu1 %vm144_vm4, %v74_v5 }
  0x31   :  { %466 = vmatprep.mubr.bf16.mxu1 %v785_v2 }
  0x38   :  { %724 = vmatmul.mubr.msk.bf16.gmra.mxu1 %vm144_vm4, %v79_v7 }
  0x86   :  { %v522_v46 = vpop.permute.xlu0 %521  ;;  %v532_v55 = vpop.permute.xlu1 %531 }
  0xd8   :  { %v192_v10 = vpop.f32.mrf.mxu0  ;;  %v315_v2 = vpop.f32.mrf.mxu1 }
  0xd9   :  { %v316_v38 = vadd.f32 %v315_v2, %v192_v10 }
  0xda   :  { %v194_v11 = vpop.f32.mrf.mxu0  ;;  %v317_v12 = vpop.f32.mrf.mxu1 }
  0xdb   :  { %v318_v44 = vadd.f32 %v317_v12, %v194_v11 }
  0xdc   :  { %v196_v13 = vpop.f32.mrf.mxu0  ;;  %v319_v14 = vpop.f32.mrf.mxu1 }
  0xdd   :  { %v320_v56 = vadd.f32 %v319_v14, %v196_v13  ;;  %v527_v13 = vpop.permute.xlu0 %526 }
  0xde   :  { %v198_v15 = vpop.f32.mrf.mxu0  ;;  %v321_v16 = vpop.f32.mrf.mxu1 }
  0xdf   :  { %v322_v57 = vadd.f32 %v321_v16, %v198_v15 }
  0xe0   :  { %v202_v17 = vpop.f32.mrf.mxu0  ;;  %v325_v18 = vpop.f32.mrf.mxu1 }
  0xe1   :  { %v326_v39 = vadd.f32 %v325_v18, %v202_v17 }
  0xe2   :  { %v204_v19 = vpop.f32.mrf.mxu0  ;;  %v327_v20 = vpop.f32.mrf.mxu1 }
  0xe3   :  { %v328_v45 = vadd.f32 %v327_v20, %v204_v19 }
  0xe4   :  { %v206_v22 = vpop.f32.mrf.mxu0  ;;  %v329_v23 = vpop.f32.mrf.mxu1 }
  0xe5   :  { %v330_v58 = vadd.f32 %v329_v23, %v206_v22  ;;  %v537_v23 = vpop.permute.xlu1 %536 }
  0xe6   :  { %v208_v24 = vpop.f32.mrf.mxu0  ;;  %v331_v25 = vpop.f32.mrf.mxu1 }
  0xe7   :  { %v332_v59 = vadd.f32 %v331_v25, %v208_v24 }
  0xe8   :  { %v212_v27 = vpop.f32.mrf.mxu0  ;;  %v335_v28 = vpop.f32.mrf.mxu1 }
  0xe9   :  { %v336_v3 = vadd.f32 %v335_v28, %v212_v27 }
  0xea   :  { %v214_v29 = vpop.f32.mrf.mxu0  ;;  %v337_v30 = vpop.f32.mrf.mxu1 }
  0xeb   :  { %v338_v4 = vadd.f32 %v337_v30, %v214_v29 }
  0xec   :  { %v216_v32 = vpop.f32.mrf.mxu0  ;;  %v339_v33 = vpop.f32.mrf.mxu1 }
  0xed   :  { %v340_v10 = vadd.f32 %v339_v33, %v216_v32 }
  0xee   :  { %v218_v36 = vpop.f32.mrf.mxu0  ;;  %v341_v37 = vpop.f32.mrf.mxu1 }
  0xef   :  { %v342_v2 = vadd.f32 %v341_v37, %v218_v36 }
  0xf0   :  { %v448_v41 = vpop.f32.mrf.mxu0  ;;  %v458_v42 = vpop.f32.mrf.mxu1 }
  0xf1   :  { %v477_v47 = vadd.f32 %v448_v41, %v316_v38  ;;  %v481_v48 = vadd.f32 %v458_v42, %v326_v39 }
  0xf2   :  { %v450_v49 = vpop.f32.mrf.mxu0  ;;  %v460_v50 = vpop.f32.mrf.mxu1 }
  0xf3   :  { %v501_v51 = vadd.f32 %v1001_v40, %v477_v47  ;;  %v505_v52 = vadd.f32 %v1001_v40, %v481_v48  ;;  %v478_v53 = vadd.f32 %v450_v49, %v318_v44  ;;  %v482_v54 = vadd.f32 %v460_v50, %v328_v45  ;;  %v542_v49 = vpop.permute.xlu0 %541 }
  0xf4   :  { %v452_v60 = vpop.f32.mrf.mxu0  ;;  %v462_v61 = vpop.f32.mrf.mxu1 }
  0xf5   :  { %v549_v62 = vmul.f32 %v522_v46, %v501_v51  ;;  %v502_v63 = vadd.f32 %v1003_v43, %v478_v53  ;;  %v506_v0 = vadd.f32 %v1003_v43, %v482_v54  ;;  %v553_v1 = vmul.f32 %v532_v55, %v505_v52 }
  0xf6   :  { %v479_v5 = vadd.f32 %v452_v60, %v320_v56  ;;  %v483_v6 = vadd.f32 %v462_v61, %v330_v58  ;;  %v454_v7 = vpop.f32.mrf.mxu0  ;;  %v464_v9 = vpop.f32.mrf.mxu1 }
  0xf7   :  { %v550_v11 = vmul.f32 %v522_v46, %v502_v63  ;;  %v554_v12 = vmul.f32 %v532_v55, %v506_v0  ;;  %v480_v16 = vadd.f32 %v454_v7, %v322_v57  ;;  %v484_v17 = vadd.f32 %v464_v9, %v332_v59 }
  0xf8   :  { %v503_v14 = vadd.f32 %v1001_v40, %v479_v5  ;;  %v507_v15 = vadd.f32 %v1001_v40, %v483_v6  ;;  %v468_v18 = vpop.f32.mrf.mxu1  ;;  %v590_v19 = vmul.f32 %v549_v62, %v549_v62  ;;  %v594_v22 = vmul.f32 %v553_v1, %v553_v1 }
  0xf9   :  { %v573_v20 = vsel %vm572_vm11, %v550_v11, 0.0  ;;  %v591_v21 = vmul.f32 %v550_v11, %v550_v11  ;;  %v504_v25 = vadd.f32 %v1003_v43, %v480_v16  ;;  %v508_v27 = vadd.f32 %v1003_v43, %v484_v17  ;;  %v547_v11 = vpop.permute.xlu1 %546 }
  0xfa   :  { %v551_v24 = vmul.f32 %v527_v13, %v503_v14  ;;  %v555_v28 = vmul.f32 %v537_v23, %v507_v15  ;;  %v470_v29 = vpop.f32.mrf.mxu1  ;;  %v576_v30 = vsel %vm572_vm11, %v554_v12, 0.0  ;;  %v595_v31 = vmul.f32 %v554_v12, %v554_v12 }
  0xfb   :  { %v485_v32 = vadd.f32 %v468_v18, %v336_v3  ;;  %v486_v33 = vadd.f32 %v470_v29, %v338_v4  ;;  %v552_v36 = vmul.f32 %v527_v13, %v504_v25  ;;  %v556_v37 = vmul.f32 %v537_v23, %v508_v27 }
  0xfc   :  { %v561_v34 = vadd.f32 %v551_v24, %v549_v62  ;;  %v592_v35 = vmul.f32 %v551_v24, %v551_v24  ;;  %v472_v38 = vpop.f32.mrf.mxu1  ;;  %v613_v39 = vsel %vm572_vm11, %v591_v21, 0.0  ;;  %v596_v41 = vmul.f32 %v555_v28, %v555_v28 }
  0xfd   :  { %v509_v42 = vadd.f32 %v1001_v40, %v485_v32  ;;  %v510_v44 = vadd.f32 %v1003_v43, %v486_v33  ;;  %v574_v46 = vsel %vm572_vm11, %v552_v36, 0.0  ;;  %v593_v47 = vmul.f32 %v552_v36, %v552_v36 }
  0xfe   :  { %v602_v45 = vadd.f32 %v592_v35, %v590_v19  ;;  %v562_v48 = vadd.f32 %v561_v34, %v553_v1  ;;  %v575_v50 = vadd.f32 %v574_v46, %v573_v20  ;;  %v597_v51 = vmul.f32 %v556_v37, %v556_v37  ;;  %v474_v58 = vpop.f32.mrf.mxu1 }
  0xff   :  { %v557_v52 = vmul.f32 %v542_v49, %v509_v42  ;;  %v487_v53 = vadd.f32 %v472_v38, %v340_v10  ;;  %v614_v54 = vsel %vm572_vm11, %v593_v47, 0.0  ;;  %v558_v57 = vmul.f32 %v542_v49, %v510_v44 }
 0x100   :  { %v563_v55 = vadd.f32 %v562_v48, %v555_v28  ;;  %v603_v56 = vadd.f32 %v602_v45, %v594_v22  ;;  %v616_v59 = vsel %vm572_vm11, %v595_v31, 0.0  ;;  %v615_v60 = vadd.f32 %v614_v54, %v613_v39 }
 0x101   :  { %v577_v61 = vadd.f32 %v576_v30, %v575_v50  ;;  %v578_v62 = vsel %vm572_vm11, %v556_v37, 0.0  ;;  %v598_v1 = vmul.f32 %v557_v52, %v557_v52  ;;  %v599_v3 = vmul.f32 %v558_v57, %v558_v57 }
 0x102   :  { %v604_v63 = vadd.f32 %v603_v56, %v596_v41  ;;  %v564_v0 = vadd.f32 %v563_v55, %v557_v52  ;;  %v617_v5 = vadd.f32 %v616_v59, %v615_v60  ;;  %v511_v6 = vadd.f32 %v1001_v40, %v487_v53  ;;  %v641_v59 = vld [vmem:[%s1043_s4] sm:$0xf] }
 0x103   :  { %v579_v4 = vadd.f32 %v578_v62, %v577_v61  ;;  %v488_v7 = vadd.f32 %v474_v58, %v342_v2  ;;  %v618_v9 = vsel %vm572_vm11, %v597_v51, 0.0  ;;  %v580_v10 = vsel %vm572_vm11, %v558_v57, 0.0 }
 0x104   :  { %v619_v12 = vadd.f32 %v618_v9, %v617_v5  ;;  %v605_v13 = vadd.f32 %v604_v63, %v598_v1  ;;  %v559_v14 = vmul.f32 %v547_v11, %v511_v6  ;;  %v620_v17 = vsel %vm572_vm11, %v599_v3, 0.0 }
 0x105   :  { %v512_v15 = vadd.f32 %v1003_v43, %v488_v7  ;;  %v581_v16 = vadd.f32 %v580_v10, %v579_v4  ;;  %v787_v39 = vmov 1983009808  }
 0x106   :  { %v565_v18 = vadd.f32 %v564_v0, %v559_v14  ;;  %v600_v19 = vmul.f32 %v559_v14, %v559_v14  ;;  %v621_v21 = vadd.f32 %v620_v17, %v619_v12  ;;  %v646_v41 = vunpack.c.l.s4 %v787_v39 }
 0x107   :  { %v560_v20 = vmul.f32 %v547_v11, %v512_v15 }
 0x108   :  { %v566_v22 = vrot.slane %v565_v18, 4  ;;  %v606_v40 = vadd.f32 %v605_v13, %v600_v19  ;;  %v647_v49 = vunpack.c.0.s8 %v646_v41 }
 0x109   :  { %v582_v2 = vsel %vm572_vm11, %v560_v20, 0.0  ;;  %v601_v23 = vmul.f32 %v560_v20, %v560_v20 }
 0x10a   :  { %v583_v24 = vadd.f32 %v582_v2, %v581_v16  ;;  %v567_v25 = vadd.f32 %v566_v22, %v565_v18  ;;  %v607_v27 = vrot.slane %v606_v40, 4  ;;  %v650_v55 = vsub.s32 %v647_v49, %v994_v26 }
 0x10b   :  { %v622_v28 = vsel %vm572_vm11, %v601_v23, 0.0 }
 0x10c   :  { %v584_v29 = vrot.slane %v583_v24, 4  ;;  %v623_v30 = vadd.f32 %v622_v28, %v621_v21  ;;  %v568_v43 = vrot.slane %v567_v25, 2  ;;  %v608_v31 = vadd.f32 %v607_v27, %v606_v40 }
 0x10e   :  { %v585_v32 = vadd.f32 %v584_v29, %v583_v24  ;;  %v624_v33 = vrot.slane %v623_v30, 4  ;;  %v609_v34 = vrot.slane %v608_v31, 2  ;;  %v569_v35 = vadd.f32 %v568_v43, %v567_v25 }
 0x110   :  { %v586_v36 = vrot.slane %v585_v32, 2  ;;  %v625_v37 = vadd.f32 %v624_v33, %v623_v30  ;;  %v610_v38 = vadd.f32 %v609_v34, %v608_v31  ;;  %v570_v46 = vrot.slane %v569_v35, 1 }
 0x112   :  { %v587_v42 = vadd.f32 %v586_v36, %v585_v32  ;;  %v626_v44 = vrot.slane %v625_v37, 2  ;;  %v611_v45 = vrot.slane %v610_v38, 1  ;;  %v571_v52 = vadd.f32 %v570_v46, %v569_v35 }
 0x114   :  { %v588_v47 = vrot.slane %v587_v42, 1  ;;  %v627_v48 = vadd.f32 %v626_v44, %v625_v37  ;;  %v612_v50 = vadd.f32 %v611_v45, %v610_v38 }
 0x116   :  { %v628_v51 = vrot.slane %v627_v48, 1  ;;  %v589_v53 = vadd.f32 %v588_v47, %v587_v42  ;;  %v631_v56 = vsel %vm64_vm2, %v571_v52, %v612_v50 }
 0x118   :  { %v629_v54 = vadd.f32 %v628_v51, %v627_v48 }
 0x11a   :  { %v632_v57 = vsel %vm64_vm2, %v589_v53, %v629_v54 }
 0x11b   :  { %v644_v58 = vcombine.low %v631_v56, %v632_v57 }
 0x11d   :  { %v651_v60 = vrot.slane %v644_v58, %v650_v55 }
 0x11f   :  { %v653_v61 = vadd.f32 %v651_v60, %v641_v59 }
 0x121   :  { %657 = vst.msk [vmem:[%s1043_s4] sm:$0xf] %vm985_vm10, %v653_v61 }

// kernel: downsample_layer.5
= control target key start
LH: loop header
LB: loop body
LE: loop exit
PB: predicated region body
PF: predicated region fallthrough
CT: control target
= control target key end

     0   :  { %vm152_vm0 = vcmask 1043456   ;;  %v822_v2 = vmov 0   ;;  %vm40_vm1 = vsmask.f32 256  ;;  %vm65_vm2 = vcmask 1040384   ;;  %s1106_s1 = inlined_call_operand.vmem [shape: bf16[3,72,144], index: 1, kind: input, shape index: {}]   ;;  %s1107_s0 = inlined_call_operand.vmem [shape: bf16[48,72], index: 0, kind: input, shape index: {}]   ;;  %s1108_s3 = inlined_call_operand.vmem [shape: f32[48,1], index: 3, kind: input, shape index: {}]   ;;  %s1109_s2 = inlined_call_operand.vmem [shape: f32[3,144], index: 2, kind: input, shape index: {}]   ;;  %s1110_s4 = inlined_call_operand.vmem [shape: bf16[48,144], index: 4, kind: output, shape index: {}]  }
   0x1   :  { %v700_v0 = vld [vmem:[%s1106_s1 + $0x88] sm:$0xff]  ;;  %v89_v1 = vld [vmem:[%s1106_s1 + $0x40] sm:$0xff]  ;;  %191 = vmatprep.mubr.bf16.mxu0 %v822_v2  ;;  %314 = vmatprep.mubr.bf16.mxu1 %v822_v2  ;;  %v783_v8 = vld [vmem:[%s1106_s1 + $0x34] ss:$8 sps:$4 sm:$0xff]   ;;  %vm145_vm4 = vcmask 588800   ;;  %vm78_vm6 = vcmask 1047552  }
   0x2   :  { %v710_v3 = vcombine.high %v700_v0, %v700_v0  ;;  %v724_v4 = vcombine.high %v89_v1, %v89_v1  ;;  %v709_v5 = vcombine.low %v700_v0, %v700_v0  ;;  %v723_v6 = vcombine.low %v89_v1, %v89_v1  ;;  %v781_v7 = vld [vmem:[%s1106_s1 + $0x7c] ss:$8 sps:$4 sm:$0xff]   ;;  %776 = vset.pattern.permute.xlu1 %v822_v2  ;;  %v785_v11 = vld [vmem:[%s1106_s1 + $0x78] ss:$8 sps:$4 sm:$0xff]   ;;  %v787_v13 = vld [vmem:[%s1106_s1 + $0x6c] ss:$8 sps:$4 sm:$0xff]  }
   0x3   :  { %775 = vset.pattern.permute.xlu0 %v822_v2  ;;  %v786_v12 = vld [vmem:[%s1106_s1 + $0x30] ss:$8 sps:$4 sm:$0xff]   ;;  %v789_v14 = vld [vmem:[%s1106_s1 + $0x24] ss:$8 sps:$4 sm:$0xff]   ;;  %v792_v16 = vld [vmem:[%s1106_s1 + $0x20] ss:$8 sps:$4 sm:$0xff]  }
   0x4   :  { %711 = vmatprep.subr.msk.bf16.mxu0 %vm152_vm0, %v710_v3  ;;  %725 = vmatprep.subr.msk.bf16.mxu1 %vm152_vm0, %v724_v4  ;;  %v154_v9 = vsel %vm152_vm0, %v709_v5, 0  ;;  %v277_v10 = vsel %vm152_vm0, %v723_v6, 0  ;;  %v791_v15 = vld [vmem:[%s1106_s1 + $0x68] ss:$8 sps:$4 sm:$0xff]   ;;  %v793_v17 = vld [vmem:[%s1106_s1 + $0x5c] ss:$8 sps:$4 sm:$0xff]   ;;  %vm928_vm3 = vmand %vm65_vm2, %vm40_vm1 }
   0x5   :  { %166 = vmatpush1.bf16.msra.mxu0 %v154_v9  ;;  %289 = vmatpush1.bf16.msra.mxu1 %v277_v10  ;;  %v795_v18 = vld [vmem:[%s1106_s1 + $0x14] ss:$8 sps:$4 sm:$0xff]   ;;  %v797_v19 = vld [vmem:[%s1106_s1 + $0x58] ss:$8 sps:$4 sm:$0xff]   ;;  %v801_v23 = vld [vmem:[%s1106_s1 + $0x4] ss:$8 sps:$4 sm:$0xff]  }
   0x6   :  { %167 = vmatprep.subr.bf16.mxu0 %v781_v7  ;;  %290 = vmatprep.subr.bf16.mxu1 %v783_v8  ;;  %v798_v20 = vld [vmem:[%s1106_s1 + $0x10] ss:$8 sps:$4 sm:$0xff]   ;;  %v799_v21 = vld [vmem:[%s1106_s1 + $0x4c] ss:$8 sps:$4 sm:$0xff]   ;;  %v904_v22 = vld [vmem:[%s1107_s0] sm:$0xff]   ;;  %vm677_vm8 = vcmask 130052  }
   0x7   :  { %v803_v24 = vld [vmem:[%s1106_s1 + $0x48] ss:$8 sps:$4 sm:$0xff]   ;;  %v42_v25 = vshrl.u32 %v904_v22, 16  ;;  %v45_v26 = vshll.u32 %v904_v22, 16  ;;  %v810_v41 = vld [vmem:[%s1106_s1 + $0xc4] ss:$8 sps:$4 sm:$0xff]   ;;  %vm1059_vm9 = vmor %vm677_vm8, %vm152_vm0 }
   0x8   :  { %v737_v27 = vld [vmem:[%s1106_s1 + $0xd0] sm:$0xff]  ;;  %v920_v28 = vld [vmem:[%s1107_s0 + $0x8] sm:$0xff]   ;;  %v593_v43 = vld [vmem:[%s1108_s3] sm:$0xff]  ;;  %vm68_vm5 = vsmask.f32 7424 }
   0x9   :  { %168 = vmatpush1.bf16.msra.mxu0 %v785_v11  ;;  %291 = vmatpush1.bf16.msra.mxu1 %v786_v12  ;;  %v804_v29 = vld [vmem:[%s1106_s1] ss:$8 sps:$4 sm:$0xff]   ;;  %v44_v30 = vrot.slane %v42_v25, 7  ;;  %v747_v32 = vcombine.high %v737_v27, %v737_v27  ;;  %v746_v33 = vcombine.low %v737_v27, %v737_v27  ;;  %v49_v34 = vshrl.u32 %v920_v28, 16  ;;  %v943_v39 = vld [vmem:[%s1107_s0 + $0x10] sm:$0xff]   ;;  %v596_v47 = vld [vmem:[%s1108_s3 + $0x18] sm:$0xff] }
   0xa   :  { %169 = vmatprep.subr.bf16.mxu0 %v787_v13  ;;  %292 = vmatprep.subr.bf16.mxu1 %v789_v14  ;;  %v52_v38 = vshll.u32 %v920_v28, 16  ;;  %v595_v42 = vld [vmem:[%s1108_s3 + $0x10] sm:$0xff]  ;;  %v808_v44 = vld [vmem:[%s1106_s1 + $0xc0] ss:$8 sps:$4 sm:$0xff]   ;;  %v57_v46 = vshrl.u32 %v943_v39, 16  ;;  %v60_v53 = vshll.u32 %v943_v39, 16  ;;  %vm79_vm7 = vmand %vm78_vm6, %vm68_vm5 }
   0xb   :  { %v47_v35 = vor.u32 %v45_v26, %v44_v30  ;;  %v51_v37 = vrot.slane %v49_v34, 7  ;;  %v410_v40 = vsel %vm152_vm0, %v746_v33, 0  ;;  %611 = vperm.xlu1 %776, %v595_v42   ;;  %601 = vperm.xlu0 %775, %v593_v43   ;;  %v594_v48 = vld [vmem:[%s1108_s3 + $0x8] sm:$0xff]  ;;  %v814_v49 = vld [vmem:[%s1106_s1 + $0xb4] ss:$8 sps:$4 sm:$0xff]   ;;  %v597_v58 = vld [vmem:[%s1108_s3 + $0x20] sm:$0xff] }
   0xc   :  { %v812_v51 = vld [vmem:[%s1106_s1 + $0xb0] ss:$8 sps:$4 sm:$0xff]   ;;  %v59_v52 = vrot.slane %v57_v46, 7  ;;  %v817_v54 = vld [vmem:[%s1106_s1 + $0xa4] ss:$8 sps:$4 sm:$0xff]   ;;  %v69_v60 = vrot.slane %v45_v26, 1 }
   0xd   :  { %170 = vmatpush1.bf16.msra.mxu0 %v791_v15  ;;  %293 = vmatpush1.bf16.msra.mxu1 %v792_v16  ;;  %v67_v36 = vsel %vm928_vm3, 0, %v47_v35  ;;  %v54_v45 = vor.u32 %v52_v38, %v51_v37  ;;  %v815_v55 = vld [vmem:[%s1106_s1 + $0xa0] ss:$8 sps:$4 sm:$0xff]   ;;  %v821_v59 = vld [vmem:[%s1106_s1 + $0x94] ss:$8 sps:$4 sm:$0xff]   ;;  %v71_v61 = vrot.slane %v52_v38, 1  ;;  %v491_v16 = vlaneseq }
   0xe   :  { %171 = vmatprep.subr.bf16.mxu0 %v793_v17  ;;  %294 = vmatprep.subr.bf16.mxu1 %v795_v18  ;;  %v62_v56 = vor.u32 %v60_v53, %v59_v52  ;;  %v598_v57 = vld [vmem:[%s1108_s3 + $0x28] sm:$0xff]  ;;  %v819_v63 = vld [vmem:[%s1106_s1 + $0x90] ss:$8 sps:$4 sm:$0xff]   ;;  %v70_v0 = vor.u32 %v69_v60, %v42_v25  ;;  %v74_v1 = vrot.slane %v60_v53, 1 }
   0xf   :  { %616 = vperm.xlu1 %776, %v596_v47   ;;  %606 = vperm.xlu0 %775, %v594_v48   ;;  %v55_v50 = vsel %vm40_vm1, %v44_v30, %v54_v45  ;;  %v73_v3 = vor.u32 %v71_v61, %v49_v34 }
  0x10   :  { %v63_v62 = vsel %vm40_vm1, %v51_v37, %v62_v56  ;;  %v72_v4 = vsel %vm68_vm5, %v70_v0, %v71_v61  ;;  %v76_v6 = vor.u32 %v74_v1, %v57_v46 }
  0x11   :  { %172 = vmatpush1.bf16.msra.mxu0 %v797_v19  ;;  %295 = vmatpush1.bf16.msra.mxu1 %v798_v20  ;;  %v75_v5 = vsel %vm68_vm5, %v73_v3, %v74_v1 }
  0x12   :  { %173 = vmatprep.subr.bf16.mxu0 %v799_v21  ;;  %296 = vmatprep.subr.bf16.mxu1 %v801_v23  ;;  %v80_v7 = vsel %vm79_vm7, %v76_v6, 0  ;;  %v492_v21 = vshrl.u32 %v491_v16, 7 }
  0x13   :  { %626 = vperm.xlu1 %776, %v598_v57   ;;  %621 = vperm.xlu0 %775, %v597_v58  }
  0x14   :  { %v493_v25 = vsub.s32 0, %v492_v21  ;;  %v497_v30 = vsub.s32 4, %v492_v21  ;;  %v527_v31 = vsub.s32 5, %v492_v21  ;;  %v553_v34 = vsub.s32 2, %v492_v21 }
  0x15   :  { %174 = vmatpush1.bf16.msra.mxu0 %v803_v24  ;;  %297 = vmatpush1.bf16.msra.mxu1 %v804_v29  ;;  %v523_v29 = vsub.s32 1, %v492_v21  ;;  %v557_v35 = vsub.s32 6, %v492_v21 }
  0x16   :  { %764 = vmatprep.subr.msk.bf16.mxu1 %vm152_vm0, %v747_v32  ;;  %748 = vmatprep.subr.msk.bf16.mxu0 %vm152_vm0, %v747_v32 }
  0x18   :  { %712 = vmatmul.mubr.msk.bf16.vlgmr.msra.gmra.mxu0 %vm145_vm4, %v904_v22  ;;  %726 = vmatmul.mubr.msk.bf16.vlgmr.msra.gmra.mxu1 %vm145_vm4, %v67_v36 }
  0x19   :  { %769 = vmatpush1.bf16.msra.mxu1 %v410_v40  ;;  %422 = vmatpush1.bf16.msra.mxu0 %v410_v40 }
  0x1a   :  { %765 = vmatprep.subr.bf16.mxu1 %v810_v41  ;;  %201 = vmatprep.mubr.bf16.mxu0 %v822_v2 }
  0x1b   :  { %324 = vmatprep.mubr.bf16.mxu1 %v822_v2  ;;  %423 = vmatprep.subr.bf16.mxu0 %v810_v41 }
  0x1d   :  { %770 = vmatpush1.bf16.msra.mxu1 %v808_v44  ;;  %424 = vmatpush1.bf16.msra.mxu0 %v808_v44 }
  0x1e   :  { %766 = vmatprep.subr.bf16.mxu1 %v814_v49  ;;  %425 = vmatprep.subr.bf16.mxu0 %v814_v49 }
  0x20   :  { %713 = vmatmul.mubr.msk.bf16.gmra.mxu0 %vm145_vm4, %v920_v28  ;;  %727 = vmatmul.mubr.msk.bf16.gmra.mxu1 %vm145_vm4, %v55_v50  ;;  %v18_v28 = vld [vmem:[%s1109_s2] sm:$0x77] }
  0x21   :  { %771 = vmatpush1.bf16.msra.mxu1 %v812_v51  ;;  %426 = vmatpush1.bf16.msra.mxu0 %v812_v51  ;;  %v494_v36 = vrot.slane %v18_v28, %v493_v25  ;;  %v498_v40 = vrot.slane %v18_v28, %v497_v30  ;;  %v528_v41 = vrot.slane %v18_v28, %v527_v31 }
  0x22   :  { %211 = vmatprep.mubr.bf16.mxu0 %v822_v2  ;;  %334 = vmatprep.mubr.bf16.mxu1 %v822_v2  ;;  %v554_v44 = vrot.slane %v18_v28, %v553_v34  ;;  %v558_v45 = vrot.slane %v18_v28, %v557_v35 }
  0x23   :  { %767 = vmatprep.subr.bf16.mxu1 %v817_v54  ;;  %427 = vmatprep.subr.bf16.mxu0 %v817_v54  ;;  %v1022_v48 = vrot.slane %v494_v36, %v493_v25  ;;  %v1026_v52 = vrot.slane %v498_v40, %v493_v25  ;;  %v1028_v53 = vrot.slane %v528_v41, %v523_v29 }
  0x25   :  { %772 = vmatpush1.bf16.msra.mxu1 %v815_v55  ;;  %428 = vmatpush1.bf16.msra.mxu0 %v815_v55 }
  0x26   :  { %429 = vmatprep.subr.bf16.mxu0 %v821_v59  ;;  %768 = vmatprep.subr.bf16.mxu1 %v821_v59 }
  0x28   :  { %714 = vmatmul.mubr.msk.bf16.gmra.mxu0 %vm145_vm4, %v943_v39  ;;  %728 = vmatmul.mubr.msk.bf16.gmra.mxu1 %vm145_vm4, %v63_v62  ;;  %v524_v39 = vrot.slane %v18_v28, %v523_v29  ;;  %v1030_v62 = vrot.slane %v554_v44, %v553_v34 }
  0x29   :  { %430 = vmatpush1.bf16.msra.mxu0 %v819_v63  ;;  %773 = vmatpush1.bf16.msra.mxu1 %v819_v63  ;;  %v1032_v63 = vrot.slane %v558_v45, %v553_v34 }
  0x2a   :  { %447 = vmatprep.mubr.bf16.mxu0 %v822_v2  ;;  %457 = vmatprep.mubr.bf16.mxu1 %v822_v2  ;;  %v1024_v50 = vrot.slane %v524_v39, %v523_v29 }
  0x30   :  { %749 = vmatmul.mubr.msk.bf16.vlgmr.msra.gmra.mxu0 %vm145_vm4, %v72_v4  ;;  %750 = vmatmul.mubr.msk.bf16.vlgmr.msra.gmra.mxu1 %vm145_vm4, %v75_v5 }
  0x31   :  { %467 = vmatprep.mubr.bf16.mxu1 %v822_v2 }
  0x38   :  { %751 = vmatmul.mubr.msk.bf16.gmra.mxu1 %vm145_vm4, %v80_v7 }
  0x86   :  { %v612_v36 = vpop.permute.xlu1 %611 }
  0xd8   :  { %v193_v8 = vpop.f32.mrf.mxu0  ;;  %v316_v9 = vpop.f32.mrf.mxu1 }
  0xd9   :  { %v317_v46 = vadd.f32 %v316_v9, %v193_v8 }
  0xda   :  { %v195_v10 = vpop.f32.mrf.mxu0  ;;  %v318_v11 = vpop.f32.mrf.mxu1 }
  0xdb   :  { %v319_v54 = vadd.f32 %v318_v11, %v195_v10 }
  0xdc   :  { %v197_v12 = vpop.f32.mrf.mxu0  ;;  %v320_v13 = vpop.f32.mrf.mxu1 }
  0xdd   :  { %v321_v58 = vadd.f32 %v320_v13, %v197_v12 }
  0xde   :  { %v199_v14 = vpop.f32.mrf.mxu0  ;;  %v322_v15 = vpop.f32.mrf.mxu1 }
  0xdf   :  { %v323_v59 = vadd.f32 %v322_v15, %v199_v14 }
  0xe0   :  { %v203_v17 = vpop.f32.mrf.mxu0  ;;  %v326_v18 = vpop.f32.mrf.mxu1 }
  0xe1   :  { %v327_v47 = vadd.f32 %v326_v18, %v203_v17 }
  0xe2   :  { %v205_v19 = vpop.f32.mrf.mxu0  ;;  %v328_v20 = vpop.f32.mrf.mxu1 }
  0xe3   :  { %v329_v55 = vadd.f32 %v328_v20, %v205_v19 }
  0xe4   :  { %v207_v2 = vpop.f32.mrf.mxu0  ;;  %v330_v22 = vpop.f32.mrf.mxu1 }
  0xe5   :  { %v331_v5 = vadd.f32 %v330_v22, %v207_v2 }
  0xe6   :  { %v209_v23 = vpop.f32.mrf.mxu0  ;;  %v332_v24 = vpop.f32.mrf.mxu1 }
  0xe7   :  { %v333_v6 = vadd.f32 %v332_v24, %v209_v23 }
  0xe8   :  { %v213_v26 = vpop.f32.mrf.mxu0  ;;  %v336_v27 = vpop.f32.mrf.mxu1 }
  0xe9   :  { %v337_v7 = vadd.f32 %v336_v27, %v213_v26 }
  0xea   :  { %v215_v32 = vpop.f32.mrf.mxu0  ;;  %v338_v33 = vpop.f32.mrf.mxu1 }
  0xeb   :  { %v339_v8 = vadd.f32 %v338_v33, %v215_v32  ;;  %v602_v33 = vpop.permute.xlu0 %601 }
  0xec   :  { %v217_v37 = vpop.f32.mrf.mxu0  ;;  %v340_v38 = vpop.f32.mrf.mxu1 }
  0xed   :  { %v341_v15 = vadd.f32 %v340_v38, %v217_v37 }
  0xee   :  { %v219_v42 = vpop.f32.mrf.mxu0  ;;  %v342_v43 = vpop.f32.mrf.mxu1 }
  0xef   :  { %v343_v16 = vadd.f32 %v342_v43, %v219_v42 }
  0xf0   :  { %v449_v49 = vpop.f32.mrf.mxu0  ;;  %v459_v51 = vpop.f32.mrf.mxu1 }
  0xf1   :  { %v478_v56 = vadd.f32 %v449_v49, %v317_v46  ;;  %v482_v57 = vadd.f32 %v459_v51, %v327_v47 }
  0xf2   :  { %v451_v60 = vpop.f32.mrf.mxu0  ;;  %v461_v61 = vpop.f32.mrf.mxu1 }
  0xf3   :  { %v509_v0 = vadd.f32 %v1022_v48, %v478_v56  ;;  %v513_v1 = vadd.f32 %v1022_v48, %v482_v57  ;;  %v479_v3 = vadd.f32 %v451_v60, %v319_v54  ;;  %v483_v4 = vadd.f32 %v461_v61, %v329_v55 }
  0xf4   :  { %v453_v9 = vpop.f32.mrf.mxu0  ;;  %v463_v10 = vpop.f32.mrf.mxu1 }
  0xf5   :  { %v539_v11 = vmul.f32 %v1024_v50, %v509_v0  ;;  %v543_v12 = vmul.f32 %v1024_v50, %v513_v1  ;;  %v510_v13 = vadd.f32 %v1026_v52, %v479_v3  ;;  %v514_v14 = vadd.f32 %v1026_v52, %v483_v4 }
  0xf6   :  { %v480_v17 = vadd.f32 %v453_v9, %v321_v58  ;;  %v484_v18 = vadd.f32 %v463_v10, %v331_v5  ;;  %v455_v19 = vpop.f32.mrf.mxu0  ;;  %v465_v20 = vpop.f32.mrf.mxu1 }
  0xf7   :  { %v540_v21 = vmul.f32 %v1028_v53, %v510_v13  ;;  %v544_v2 = vmul.f32 %v1028_v53, %v514_v14  ;;  %v481_v22 = vadd.f32 %v455_v19, %v323_v59  ;;  %v485_v23 = vadd.f32 %v465_v20, %v333_v6  ;;  %v607_v5 = vpop.permute.xlu0 %606  ;;  %v617_v9 = vpop.permute.xlu1 %616 }
  0xf8   :  { %v511_v24 = vadd.f32 %v1022_v48, %v480_v17  ;;  %v515_v25 = vadd.f32 %v1022_v48, %v484_v18  ;;  %v469_v26 = vpop.f32.mrf.mxu1  ;;  %v573_v27 = vadd.f32 %v1030_v62, %v543_v12  ;;  %v569_v28 = vadd.f32 %v1030_v62, %v539_v11 }
  0xf9   :  { %v512_v29 = vadd.f32 %v1026_v52, %v481_v22  ;;  %v516_v30 = vadd.f32 %v1026_v52, %v485_v23  ;;  %v486_v31 = vadd.f32 %v469_v26, %v337_v7  ;;  %v574_v32 = vadd.f32 %v1032_v63, %v544_v2 }
  0xfa   :  { %v541_v34 = vmul.f32 %v1024_v50, %v511_v24  ;;  %v545_v35 = vmul.f32 %v1024_v50, %v515_v25  ;;  %v585_v37 = vmax.f32 %v573_v27, 0.0  ;;  %v570_v38 = vadd.f32 %v1032_v63, %v540_v21  ;;  %v471_v39 = vpop.f32.mrf.mxu1 }
  0xfb   :  { %v542_v40 = vmul.f32 %v1028_v53, %v512_v29  ;;  %v546_v41 = vmul.f32 %v1028_v53, %v516_v30  ;;  %v517_v42 = vadd.f32 %v1022_v48, %v486_v31  ;;  %v586_v43 = vmax.f32 %v574_v32, 0.0  ;;  %v622_v25 = vpop.permute.xlu0 %621  ;;  %v627_v30 = vpop.permute.xlu1 %626 }
  0xfc   :  { %v633_v44 = vmul.f32 %v612_v36, %v585_v37  ;;  %v581_v45 = vmax.f32 %v569_v28, 0.0  ;;  %v582_v46 = vmax.f32 %v570_v38, 0.0  ;;  %v487_v47 = vadd.f32 %v471_v39, %v339_v8  ;;  %v473_v49 = vpop.f32.mrf.mxu1 }
  0xfd   :  { %v547_v51 = vmul.f32 %v1024_v50, %v517_v42  ;;  %v634_v54 = vmul.f32 %v612_v36, %v586_v43  ;;  %v488_v55 = vadd.f32 %v473_v49, %v341_v15  ;;  %v575_v56 = vadd.f32 %v1030_v62, %v545_v35 }
  0xfe   :  { %v629_v58 = vmul.f32 %v602_v33, %v581_v45  ;;  %v630_v59 = vmul.f32 %v602_v33, %v582_v46  ;;  %v518_v60 = vadd.f32 %v1026_v52, %v487_v47  ;;  %v576_v61 = vadd.f32 %v1032_v63, %v546_v41  ;;  %v475_v0 = vpop.f32.mrf.mxu1 }
  0xff   :  { %v760_v1 = vpack.c.bf16 %v634_v54, %v633_v44  ;;  %v519_v3 = vadd.f32 %v1022_v48, %v488_v55  ;;  %v587_v4 = vmax.f32 %v575_v56, 0.0  ;;  %v571_v6 = vadd.f32 %v1030_v62, %v541_v34 }
 0x100   :  { %v758_v7 = vpack.c.bf16 %v630_v59, %v629_v58  ;;  %v548_v8 = vmul.f32 %v1028_v53, %v518_v60  ;;  %v588_v10 = vmax.f32 %v576_v61, 0.0  ;;  %v572_v11 = vadd.f32 %v1032_v63, %v542_v40 }
 0x101   :  { %681 = vst.msk [vmem:[%s1110_s4 + $0x10] sm:$0xff] %vm1059_vm9, %v760_v1  ;;  %v549_v12 = vmul.f32 %v1024_v50, %v519_v3  ;;  %v635_v48 = vmul.f32 %v617_v9, %v587_v4  ;;  %v583_v13 = vmax.f32 %v571_v6, 0.0  ;;  %v489_v14 = vadd.f32 %v475_v0, %v343_v16 }
 0x102   :  { %679 = vst.msk [vmem:[%s1110_s4] sm:$0xff] %vm1059_vm9, %v758_v7  ;;  %v636_v15 = vmul.f32 %v617_v9, %v588_v10  ;;  %v584_v17 = vmax.f32 %v572_v11, 0.0  ;;  %v577_v18 = vadd.f32 %v1030_v62, %v547_v51  ;;  %v578_v19 = vadd.f32 %v1032_v63, %v548_v8 }
 0x103   :  { %v631_v20 = vmul.f32 %v607_v5, %v583_v13  ;;  %v520_v21 = vadd.f32 %v1026_v52, %v489_v14  ;;  %v579_v50 = vadd.f32 %v1030_v62, %v549_v12 }
 0x104   :  { %v761_v2 = vpack.c.bf16 %v636_v15, %v635_v48  ;;  %v632_v22 = vmul.f32 %v607_v5, %v584_v17  ;;  %v589_v16 = vmax.f32 %v577_v18, 0.0  ;;  %v590_v23 = vmax.f32 %v578_v19, 0.0 }
 0x105   :  { %v550_v24 = vmul.f32 %v1028_v53, %v520_v21  ;;  %v591_v29 = vmax.f32 %v579_v50, 0.0 }
 0x106   :  { %682 = vst.msk [vmem:[%s1110_s4 + $0x18] sm:$0xff] %vm1059_vm9, %v761_v2  ;;  %v759_v26 = vpack.c.bf16 %v632_v22, %v631_v20  ;;  %v637_v27 = vmul.f32 %v622_v25, %v589_v16  ;;  %v638_v28 = vmul.f32 %v622_v25, %v590_v23 }
 0x107   :  { %v580_v52 = vadd.f32 %v1032_v63, %v550_v24  ;;  %v639_v31 = vmul.f32 %v627_v30, %v591_v29 }
 0x108   :  { %680 = vst.msk [vmem:[%s1110_s4 + $0x8] sm:$0xff] %vm1059_vm9, %v759_v26  ;;  %v762_v53 = vpack.c.bf16 %v638_v28, %v637_v27 }
 0x109   :  { %v592_v62 = vmax.f32 %v580_v52, 0.0 }
 0x10a   :  { %683 = vst.msk [vmem:[%s1110_s4 + $0x20] sm:$0xff] %vm1059_vm9, %v762_v53 }
 0x10b   :  { %v640_v32 = vmul.f32 %v627_v30, %v592_v62 }
 0x10d   :  { %v763_v33 = vpack.c.bf16 %v640_v32, %v639_v31 }
 0x10f   :  { %684 = vst.msk [vmem:[%s1110_s4 + $0x28] sm:$0xff] %vm1059_vm9, %v763_v33 }

// kernel: downsample_layer.6
= control target key start
LH: loop header
LB: loop body
LE: loop exit
PB: predicated region body
PF: predicated region fallthrough
CT: control target
= control target key end

     0   :  { %v1073_v2 = vmov 0   ;;  %vm258_vm0 = vcmask 130048   ;;  %vm48_vm1 = vsmask.f32 256  ;;  %vm99_vm2 = vcmask 1040384   ;;  %s1456_s1 = inlined_call_operand.vmem [shape: bf16[3,144,144], index: 1, kind: input, shape index: {}]   ;;  %s1457_s0 = inlined_call_operand.vmem [shape: bf16[48,144], index: 0, kind: input, shape index: {}]   ;;  %s1458_s3 = inlined_call_operand.vmem [shape: f32[48,1], index: 3, kind: input, shape index: {}]   ;;  %s1459_s4 = inlined_call_operand.vmem [shape: f32[2,144], index: 4, kind: output, shape index: {}]   ;;  %s1460_s2 = inlined_call_operand.vmem [shape: f32[1,144], index: 2, kind: input, shape index: {}]  }
   0x1   :  { %v983_v0 = vld [vmem:[%s1456_s1 + $0x104] ss:$8 sps:$4 sm:$0xff]   ;;  %v985_v1 = vld [vmem:[%s1456_s1 + $0x74] ss:$8 sps:$4 sm:$0xff]   ;;  %981 = vset.pattern.permute.xlu0 %v1073_v2  ;;  %982 = vset.pattern.permute.xlu1 %v1073_v2  ;;  %v987_v3 = vld [vmem:[%s1456_s1 + $0x100] ss:$8 sps:$4 sm:$0xff]  }
   0x2   :  { %265 = vmatprep.subr.bf16.mxu0 %v983_v0  ;;  %v988_v4 = vld [vmem:[%s1456_s1 + $0x70] ss:$8 sps:$4 sm:$0xff]   ;;  %427 = vmatprep.subr.bf16.mxu1 %v985_v1  ;;  %v989_v5 = vld [vmem:[%s1456_s1 + $0xf4] ss:$8 sps:$4 sm:$0xff]   ;;  %v991_v6 = vld [vmem:[%s1456_s1 + $0x64] ss:$8 sps:$4 sm:$0xff]  }
   0x3   :  { %266 = vmatpush1.bf16.msra.mxu0 %v987_v3  ;;  %428 = vmatpush1.bf16.msra.mxu1 %v988_v4  ;;  %v993_v7 = vld [vmem:[%s1456_s1 + $0xf0] ss:$8 sps:$4 sm:$0xff]   ;;  %v994_v8 = vld [vmem:[%s1456_s1 + $0x60] ss:$8 sps:$4 sm:$0xff]   ;;  %v995_v9 = vld [vmem:[%s1456_s1 + $0xe4] ss:$8 sps:$4 sm:$0xff]  }
   0x4   :  { %267 = vmatprep.subr.bf16.mxu0 %v989_v5  ;;  %429 = vmatprep.subr.bf16.mxu1 %v991_v6  ;;  %v997_v10 = vld [vmem:[%s1456_s1 + $0x54] ss:$8 sps:$4 sm:$0xff]   ;;  %v999_v11 = vld [vmem:[%s1456_s1 + $0xe0] ss:$8 sps:$4 sm:$0xff]   ;;  %v1000_v12 = vld [vmem:[%s1456_s1 + $0x50] ss:$8 sps:$4 sm:$0xff]  }
   0x5   :  { %v1001_v13 = vld [vmem:[%s1456_s1 + $0xd4] ss:$8 sps:$4 sm:$0xff]   ;;  %v1003_v14 = vld [vmem:[%s1456_s1 + $0x44] ss:$8 sps:$4 sm:$0xff]   ;;  %v1005_v15 = vld [vmem:[%s1456_s1 + $0xd0] ss:$8 sps:$4 sm:$0xff]  }
   0x6   :  { %v1006_v16 = vld [vmem:[%s1456_s1 + $0x40] ss:$8 sps:$4 sm:$0xff]   ;;  %v1007_v17 = vld [vmem:[%s1456_s1 + $0xc4] ss:$8 sps:$4 sm:$0xff]   ;;  %v1009_v18 = vld [vmem:[%s1456_s1 + $0x34] ss:$8 sps:$4 sm:$0xff]  }
   0x7   :  { %268 = vmatpush1.bf16.msra.mxu0 %v993_v7  ;;  %430 = vmatpush1.bf16.msra.mxu1 %v994_v8  ;;  %v1011_v19 = vld [vmem:[%s1456_s1 + $0xc0] ss:$8 sps:$4 sm:$0xff]   ;;  %v1012_v20 = vld [vmem:[%s1456_s1 + $0x30] ss:$8 sps:$4 sm:$0xff]   ;;  %v1013_v21 = vld [vmem:[%s1456_s1 + $0xb4] ss:$8 sps:$4 sm:$0xff]  }
   0x8   :  { %269 = vmatprep.subr.bf16.mxu0 %v995_v9  ;;  %431 = vmatprep.subr.bf16.mxu1 %v997_v10  ;;  %v1015_v22 = vld [vmem:[%s1456_s1 + $0x24] ss:$8 sps:$4 sm:$0xff]   ;;  %v1017_v23 = vld [vmem:[%s1456_s1 + $0xb0] ss:$8 sps:$4 sm:$0xff]   ;;  %v1018_v24 = vld [vmem:[%s1456_s1 + $0x20] ss:$8 sps:$4 sm:$0xff]  }
   0x9   :  { %v1019_v25 = vld [vmem:[%s1456_s1 + $0xa4] ss:$8 sps:$4 sm:$0xff]   ;;  %v1021_v26 = vld [vmem:[%s1456_s1 + $0x14] ss:$8 sps:$4 sm:$0xff]   ;;  %v1023_v27 = vld [vmem:[%s1456_s1 + $0xa0] ss:$8 sps:$4 sm:$0xff]  }
   0xa   :  { %v1024_v28 = vld [vmem:[%s1456_s1 + $0x10] ss:$8 sps:$4 sm:$0xff]   ;;  %v1025_v29 = vld [vmem:[%s1456_s1 + $0x94] ss:$8 sps:$4 sm:$0xff]   ;;  %v1191_v30 = vld [vmem:[%s1457_s0 + $0x4] ss:$8 sps:$4 sm:$0xff]  }
   0xb   :  { %270 = vmatpush1.bf16.msra.mxu0 %v999_v11  ;;  %432 = vmatpush1.bf16.msra.mxu1 %v1000_v12  ;;  %v1027_v31 = vld [vmem:[%s1456_s1 + $0x4] ss:$8 sps:$4 sm:$0xff]   ;;  %v1199_v32 = vld [vmem:[%s1457_s0] ss:$8 sps:$4 sm:$0xff]   ;;  %v1029_v33 = vld [vmem:[%s1456_s1 + $0x90] ss:$8 sps:$4 sm:$0xff]  }
   0xc   :  { %271 = vmatprep.subr.bf16.mxu0 %v1001_v13  ;;  %433 = vmatprep.subr.bf16.mxu1 %v1003_v14  ;;  %v57_v34 = vshrl.u32 %v1191_v30, 16  ;;  %v60_v35 = vshll.u32 %v1191_v30, 16  ;;  %v1030_v36 = vld [vmem:[%s1456_s1] ss:$8 sps:$4 sm:$0xff]   ;;  %v50_v37 = vshrl.u32 %v1199_v32, 16  ;;  %v53_v38 = vshll.u32 %v1199_v32, 16  ;;  %vm1223_vm3 = vmand %vm99_vm2, %vm48_vm1 }
   0xd   :  { %897 = vmatprep.mubr.msk.bf16.mxu0 %vm258_vm0, %v1191_v30  ;;  %v1031_v39 = vld [vmem:[%s1456_s1 + $0x114] ss:$8 sps:$4 sm:$0xff]   ;;  %v1033_v40 = vld [vmem:[%s1456_s1 + $0x84] ss:$8 sps:$4 sm:$0xff]   ;;  %v1035_v44 = vld [vmem:[%s1456_s1 + $0x110] ss:$8 sps:$4 sm:$0xff]  }
   0xe   :  { %v59_v41 = vrot.slane %v57_v34, 7  ;;  %v52_v43 = vrot.slane %v50_v37, 7  ;;  %v1036_v46 = vld [vmem:[%s1456_s1 + $0x80] ss:$8 sps:$4 sm:$0xff]   ;;  %v1244_v49 = vld [vmem:[%s1457_s0 + $0x14] ss:$8 sps:$4 sm:$0xff]  }
   0xf   :  { %272 = vmatpush1.bf16.msra.mxu0 %v1005_v15  ;;  %434 = vmatpush1.bf16.msra.mxu1 %v1006_v16  ;;  %v1249_v50 = vld [vmem:[%s1457_s0 + $0x10] ss:$8 sps:$4 sm:$0xff]   ;;  %v1042_v51 = vld [vmem:[%s1456_s1 + $0x194] ss:$8 sps:$4 sm:$0xff]   ;;  %v72_v52 = vshrl.u32 %v1244_v49, 16  ;;  %v75_v53 = vshll.u32 %v1244_v49, 16 }
  0x10   :  { %273 = vmatprep.subr.bf16.mxu0 %v1007_v17  ;;  %435 = vmatprep.subr.bf16.mxu1 %v1009_v18  ;;  %v62_v45 = vor.u32 %v60_v35, %v59_v41  ;;  %v55_v47 = vor.u32 %v53_v38, %v52_v43  ;;  %v64_v54 = vshrl.u32 %v1249_v50, 16  ;;  %v1040_v56 = vld [vmem:[%s1456_s1 + $0x190] ss:$8 sps:$4 sm:$0xff]   ;;  %v67_v57 = vshll.u32 %v1249_v50, 16  ;;  %v1273_v60 = vld [vmem:[%s1457_s0 + $0x24] ss:$8 sps:$4 sm:$0xff]  }
  0x11   :  { %v74_v58 = vrot.slane %v72_v52, 7  ;;  %v1045_v61 = vld [vmem:[%s1456_s1 + $0x184] ss:$8 sps:$4 sm:$0xff]   ;;  %v1281_v62 = vld [vmem:[%s1457_s0 + $0x20] ss:$8 sps:$4 sm:$0xff]   ;;  %v88_v0 = vshrl.u32 %v1273_v60, 16 }
  0x12   :  { %v102_v48 = vsel %vm1223_vm3, 0, %v62_v45  ;;  %v101_v55 = vsel %vm1223_vm3, 0, %v55_v47  ;;  %v1268_v59 = vrot.slane %v64_v54, 7  ;;  %v91_v1 = vshll.u32 %v1273_v60, 16  ;;  %v1043_v2 = vld [vmem:[%s1456_s1 + $0x180] ss:$8 sps:$4 sm:$0xff]  }
  0x13   :  { %274 = vmatpush1.bf16.msra.mxu0 %v1011_v19  ;;  %436 = vmatpush1.bf16.msra.mxu1 %v1012_v20  ;;  %v77_v63 = vor.u32 %v75_v53, %v74_v58  ;;  %v90_v5 = vrot.slane %v88_v0, 7  ;;  %v80_v6 = vshrl.u32 %v1281_v62, 16  ;;  %v1048_v7 = vld [vmem:[%s1456_s1 + $0x174] ss:$8 sps:$4 sm:$0xff]   ;;  %v707_v8 = vld [vmem:[%s1458_s3] sm:$0xff]  ;;  %v83_v14 = vshll.u32 %v1281_v62, 16 }
  0x14   :  { %275 = vmatprep.subr.bf16.mxu0 %v1013_v21  ;;  %437 = vmatprep.subr.bf16.mxu1 %v1015_v22  ;;  %v69_v4 = vor.u32 %v67_v57, %v1268_v59  ;;  %v709_v10 = vld [vmem:[%s1458_s3 + $0x10] sm:$0xff]  ;;  %v1051_v15 = vld [vmem:[%s1456_s1 + $0x164] ss:$8 sps:$4 sm:$0xff]   ;;  %v108_v16 = vrot.slane %v60_v35, 1  ;;  %v110_v18 = vrot.slane %v75_v53, 1  ;;  %v710_v22 = vld [vmem:[%s1458_s3 + $0x18] sm:$0xff] }
  0x15   :  { %918 = vmatprep.mubr.msk.bf16.mxu1 %vm258_vm0, %v102_v48  ;;  %v78_v3 = vsel %vm48_vm1, %v59_v41, %v77_v63  ;;  %v93_v9 = vor.u32 %v91_v1, %v90_v5  ;;  %715 = vperm.xlu0 %981, %v707_v8   ;;  %v1046_v11 = vld [vmem:[%s1456_s1 + $0x170] ss:$8 sps:$4 sm:$0xff]   ;;  %v82_v13 = vrot.slane %v80_v6, 7  ;;  %v1049_v19 = vld [vmem:[%s1456_s1 + $0x160] ss:$8 sps:$4 sm:$0xff]   ;;  %v104_v41 = vrot.slane %v53_v38, 1 }
  0x16   :  { %v70_v12 = vsel %vm48_vm1, %v52_v43, %v69_v4  ;;  %725 = vperm.xlu1 %982, %v709_v10   ;;  %v708_v21 = vld [vmem:[%s1458_s3 + $0x8] sm:$0xff]  ;;  %vm103_vm4 = vsmask.f32 7424  ;;  %v106_v43 = vrot.slane %v67_v57, 1  ;;  %vm124_vm5 = vcmask 1047552  }
  0x17   :  { %276 = vmatpush1.bf16.msra.mxu0 %v1017_v23  ;;  %438 = vmatpush1.bf16.msra.mxu1 %v1018_v24  ;;  %v94_v17 = vsel %vm48_vm1, %v74_v58, %v93_v9  ;;  %v85_v20 = vor.u32 %v83_v14, %v82_v13  ;;  %v1057_v23 = vld [vmem:[%s1456_s1 + $0x154] ss:$8 sps:$4 sm:$0xff]   ;;  %v109_v24 = vor.u32 %v108_v16, %v57_v34  ;;  %v711_v34 = vld [vmem:[%s1458_s3 + $0x20] sm:$0xff]  ;;  %v712_v35 = vld [vmem:[%s1458_s3 + $0x28] sm:$0xff]  ;;  %v113_v47 = vrot.slane %v83_v14, 1 }
  0x18   :  { %277 = vmatprep.subr.bf16.mxu0 %v1019_v25  ;;  %439 = vmatprep.subr.bf16.mxu1 %v1021_v26  ;;  %v115_v25 = vor.u32 %v110_v18, %v72_v52  ;;  %v116_v26 = vrot.slane %v91_v1, 1  ;;  %v1067_v42 = vld [vmem:[%s1456_s1 + $0x120] ss:$8 sps:$4 sm:$0xff]   ;;  %v105_v45 = vor.u32 %v104_v41, %v50_v37  ;;  %vm125_vm6 = vmand %vm124_vm5, %vm103_vm4  ;;  %vm830_vm7 = vcmask 1041408  }
  0x19   :  { %720 = vperm.xlu0 %981, %v708_v21   ;;  %v111_v30 = vsel %vm103_vm4, %v109_v24, %v110_v18  ;;  %v1070_v38 = vld [vmem:[%s1456_s1 + $0x1a0] ss:$8 sps:$4 sm:$0xff]   ;;  %vm831_vm8 = vcmask 125954   ;;  %v1074_v53 = vmov 0.0   ;;  %v685_v8 = vlaneseq }
  0x1a   :  { %730 = vperm.xlu1 %982, %v710_v22   ;;  %v119_v48 = vor.u32 %v116_v26, %v88_v0  ;;  %vm1401_vm9 = vmor %vm831_vm8, %vm830_vm7 }
  0x1b   :  { %278 = vmatpush1.bf16.msra.mxu0 %v1023_v27  ;;  %440 = vmatpush1.bf16.msra.mxu1 %v1024_v28  ;;  %v1055_v27 = vld [vmem:[%s1456_s1 + $0x150] ss:$8 sps:$4 sm:$0xff]   ;;  %v86_v28 = vsel %vm48_vm1, %v1268_v59, %v85_v20  ;;  %833 = vst.msk [vmem:[%s1459_s4] sm:$0xf] %vm1401_vm9, %v1074_v53 }
  0x1c   :  { %279 = vmatprep.subr.bf16.mxu0 %v1025_v29  ;;  %441 = vmatprep.subr.bf16.mxu1 %v1027_v31  ;;  %v1060_v29 = vld [vmem:[%s1456_s1 + $0x144] ss:$8 sps:$4 sm:$0xff]   ;;  %v117_v31 = vsel %vm103_vm4, %v115_v25, %v116_v26 }
  0x1d   :  { %735 = vperm.xlu0 %981, %v711_v34  }
  0x1e   :  { %740 = vperm.xlu1 %982, %v712_v35  }
  0x1f   :  { %280 = vmatpush1.bf16.msra.mxu0 %v1029_v33  ;;  %442 = vmatpush1.bf16.msra.mxu1 %v1030_v36  ;;  %v1058_v33 = vld [vmem:[%s1456_s1 + $0x140] ss:$8 sps:$4 sm:$0xff]   ;;  %v1066_v36 = vld [vmem:[%s1456_s1 + $0x134] ss:$8 sps:$4 sm:$0xff]  }
  0x20   :  { %295 = vmatprep.subr.bf16.mxu0 %v1031_v39  ;;  %457 = vmatprep.subr.bf16.mxu1 %v1033_v40  ;;  %v1064_v39 = vld [vmem:[%s1456_s1 + $0x130] ss:$8 sps:$4 sm:$0xff]   ;;  %v1069_v40 = vld [vmem:[%s1456_s1 + $0x124] ss:$8 sps:$4 sm:$0xff]  }
  0x23   :  { %296 = vmatpush2.bf16.msra.mxu0 %v1035_v44  ;;  %458 = vmatpush2.bf16.msra.mxu1 %v1036_v46  ;;  %v1072_v44 = vld [vmem:[%s1456_s1 + $0x1a4] ss:$8 sps:$4 sm:$0xff]   ;;  %v112_v46 = vor.u32 %v106_v43, %v64_v54 }
  0x24   :  { %608 = vmatprep.subr.bf16.mxu0 %v1042_v51  ;;  %960 = vmatprep.subr.bf16.mxu1 %v1042_v51 }
  0x25   :  { %v114_v37 = vsel %vm103_vm4, %v112_v46, %v113_v47 }
  0x26   :  { %298 = vmatmul.mubr.bf16.vlgmr.msra.gmra.mxu0 %v1199_v32  ;;  %460 = vmatmul.mubr.bf16.vlgmr.msra.gmra.mxu1 %v101_v55  ;;  %v107_v32 = vsel %vm103_vm4, %v105_v45, %v106_v43 }
  0x27   :  { %609 = vmatpush1.bf16.msra.mxu0 %v1040_v56  ;;  %969 = vmatpush1.bf16.msra.mxu1 %v1040_v56 }
  0x28   :  { %610 = vmatprep.subr.bf16.mxu0 %v1045_v61  ;;  %961 = vmatprep.subr.bf16.mxu1 %v1045_v61 }
  0x29   :  { %898 = vmatprep.mubr.msk.bf16.mxu0 %vm258_vm0, %v1244_v49  ;;  %919 = vmatprep.mubr.msk.bf16.mxu1 %vm258_vm0, %v78_v3  ;;  %v127_v49 = vsel %vm125_vm6, %v119_v48, 0 }
  0x2b   :  { %611 = vmatpush1.bf16.msra.mxu0 %v1043_v2  ;;  %970 = vmatpush1.bf16.msra.mxu1 %v1043_v2 }
  0x2c   :  { %612 = vmatprep.subr.bf16.mxu0 %v1048_v7  ;;  %962 = vmatprep.subr.bf16.mxu1 %v1048_v7 }
  0x2e   :  { %308 = vmatmul.mubr.bf16.gmra.mxu0 %v1249_v50  ;;  %470 = vmatmul.mubr.bf16.gmra.mxu1 %v70_v12  ;;  %v118_v50 = vor.u32 %v113_v47, %v80_v6 }
  0x2f   :  { %613 = vmatpush1.bf16.msra.mxu0 %v1046_v11  ;;  %971 = vmatpush1.bf16.msra.mxu1 %v1046_v11  ;;  %v1410_v11 = vshrl.u32 %v685_v8, 7 }
  0x30   :  { %614 = vmatprep.subr.bf16.mxu0 %v1051_v15  ;;  %963 = vmatprep.subr.bf16.mxu1 %v1051_v15  ;;  %v126_v51 = vsel %vm125_vm6, %v118_v50, 0  ;;  %v683_v15 = vld [vmem:[%s1460_s2] sm:$0x3] }
  0x31   :  { %899 = vmatprep.mubr.msk.bf16.mxu0 %vm258_vm0, %v1273_v60  ;;  %920 = vmatprep.mubr.msk.bf16.mxu1 %vm258_vm0, %v94_v17  ;;  %v687_v14 = vsub.s32 0, %v1410_v11  ;;  %v691_v16 = vsub.s32 1, %v1410_v11 }
  0x33   :  { %615 = vmatpush1.bf16.msra.mxu0 %v1049_v19  ;;  %972 = vmatpush1.bf16.msra.mxu1 %v1049_v19  ;;  %v1417_v21 = vrot.slane %v683_v15, %v687_v14  ;;  %v1419_v24 = vrot.slane %v683_v15, %v691_v16 }
  0x34   :  { %616 = vmatprep.subr.bf16.mxu0 %v1057_v23  ;;  %964 = vmatprep.subr.bf16.mxu1 %v1057_v23 }
  0x36   :  { %318 = vmatmul.mubr.bf16.gmra.mxu0 %v1281_v62  ;;  %480 = vmatmul.mubr.bf16.gmra.mxu1 %v86_v28 }
  0x37   :  { %617 = vmatpush1.bf16.msra.mxu0 %v1055_v27  ;;  %973 = vmatpush1.bf16.msra.mxu1 %v1055_v27 }
  0x38   :  { %618 = vmatprep.subr.bf16.mxu0 %v1060_v29  ;;  %965 = vmatprep.subr.bf16.mxu1 %v1060_v29 }
  0x39   :  { %957 = vmatprep.mubr.msk.bf16.mxu0 %vm258_vm0, %v111_v30  ;;  %958 = vmatprep.mubr.msk.bf16.mxu1 %vm258_vm0, %v117_v31 }
  0x3b   :  { %619 = vmatpush1.bf16.msra.mxu0 %v1058_v33  ;;  %974 = vmatpush1.bf16.msra.mxu1 %v1058_v33 }
  0x3c   :  { %620 = vmatprep.subr.bf16.mxu0 %v1066_v36  ;;  %966 = vmatprep.subr.bf16.mxu1 %v1066_v36 }
  0x3f   :  { %621 = vmatpush1.bf16.msra.mxu0 %v1064_v39  ;;  %975 = vmatpush1.bf16.msra.mxu1 %v1064_v39 }
  0x40   :  { %622 = vmatprep.subr.bf16.mxu0 %v1069_v40  ;;  %967 = vmatprep.subr.bf16.mxu1 %v1069_v40 }
  0x43   :  { %623 = vmatpush1.bf16.msra.mxu0 %v1067_v42  ;;  %976 = vmatpush1.bf16.msra.mxu1 %v1067_v42 }
  0x44   :  { %638 = vmatprep.subr.bf16.mxu0 %v1072_v44  ;;  %968 = vmatprep.subr.bf16.mxu1 %v1072_v44 }
  0x47   :  { %639 = vmatpush2.bf16.msra.mxu0 %v1070_v38  ;;  %977 = vmatpush2.bf16.msra.mxu1 %v1070_v38 }
  0x4a   :  { %641 = vmatmul.mubr.bf16.vlgmr.msra.gmra.mxu0 %v107_v32  ;;  %651 = vmatmul.mubr.bf16.vlgmr.msra.gmra.mxu1 %v114_v37 }
  0x4b   :  { %959 = vmatprep.mubr.msk.bf16.mxu1 %vm258_vm0, %v127_v49 }
  0x52   :  { %661 = vmatmul.mubr.bf16.gmra.mxu1 %v126_v51 }
  0x90   :  { %v716_v27 = vpop.permute.xlu0 %715 }
  0x91   :  { %v726_v35 = vpop.permute.xlu1 %725 }
  0xe6   :  { %v299_v54 = vpop.f32.mrf.mxu0  ;;  %v461_v55 = vpop.f32.mrf.mxu1 }
  0xe7   :  { %v462_v19 = vadd.f32 %v461_v55, %v299_v54 }
  0xe8   :  { %v301_v56 = vpop.f32.mrf.mxu0  ;;  %v463_v57 = vpop.f32.mrf.mxu1 }
  0xe9   :  { %v464_v25 = vadd.f32 %v463_v57, %v301_v56 }
  0xea   :  { %v303_v58 = vpop.f32.mrf.mxu0  ;;  %v465_v59 = vpop.f32.mrf.mxu1 }
  0xeb   :  { %v466_v40 = vadd.f32 %v465_v59, %v303_v58  ;;  %v721_v58 = vpop.permute.xlu0 %720 }
  0xec   :  { %v305_v60 = vpop.f32.mrf.mxu0  ;;  %v467_v61 = vpop.f32.mrf.mxu1 }
  0xed   :  { %v468_v41 = vadd.f32 %v467_v61, %v305_v60 }
  0xee   :  { %v309_v62 = vpop.f32.mrf.mxu0  ;;  %v471_v63 = vpop.f32.mrf.mxu1 }
  0xef   :  { %v472_v20 = vadd.f32 %v471_v63, %v309_v62 }
  0xf0   :  { %v311_v0 = vpop.f32.mrf.mxu0  ;;  %v473_v1 = vpop.f32.mrf.mxu1 }
  0xf1   :  { %v474_v26 = vadd.f32 %v473_v1, %v311_v0 }
  0xf2   :  { %v313_v2 = vpop.f32.mrf.mxu0  ;;  %v475_v3 = vpop.f32.mrf.mxu1 }
  0xf3   :  { %v476_v42 = vadd.f32 %v475_v3, %v313_v2 }
  0xf4   :  { %v315_v4 = vpop.f32.mrf.mxu0  ;;  %v477_v5 = vpop.f32.mrf.mxu1 }
  0xf5   :  { %v478_v43 = vadd.f32 %v477_v5, %v315_v4  ;;  %v731_v4 = vpop.permute.xlu1 %730 }
  0xf6   :  { %v319_v6 = vpop.f32.mrf.mxu0  ;;  %v481_v7 = vpop.f32.mrf.mxu1 }
  0xf7   :  { %v482_v32 = vadd.f32 %v481_v7, %v319_v6 }
  0xf8   :  { %v321_v9 = vpop.f32.mrf.mxu0  ;;  %v483_v10 = vpop.f32.mrf.mxu1 }
  0xf9   :  { %v484_v37 = vadd.f32 %v483_v10, %v321_v9 }
  0xfa   :  { %v323_v12 = vpop.f32.mrf.mxu0  ;;  %v485_v13 = vpop.f32.mrf.mxu1 }
  0xfb   :  { %v486_v54 = vadd.f32 %v485_v13, %v323_v12 }
  0xfc   :  { %v325_v17 = vpop.f32.mrf.mxu0  ;;  %v487_v18 = vpop.f32.mrf.mxu1 }
  0xfd   :  { %v488_v55 = vadd.f32 %v487_v18, %v325_v17 }
 0x10a   :  { %v642_v22 = vpop.f32.mrf.mxu0  ;;  %v652_v23 = vpop.f32.mrf.mxu1 }
 0x10b   :  { %v671_v28 = vadd.f32 %v642_v22, %v462_v19  ;;  %v675_v29 = vadd.f32 %v652_v23, %v472_v20 }
 0x10c   :  { %v644_v30 = vpop.f32.mrf.mxu0  ;;  %v654_v31 = vpop.f32.mrf.mxu1 }
 0x10d   :  { %v695_v33 = vadd.f32 %v1417_v21, %v671_v28  ;;  %v699_v34 = vadd.f32 %v1417_v21, %v675_v29  ;;  %v672_v36 = vadd.f32 %v644_v30, %v464_v25  ;;  %v676_v39 = vadd.f32 %v654_v31, %v474_v26  ;;  %v736_v28 = vpop.permute.xlu0 %735 }
 0x10e   :  { %v646_v44 = vpop.f32.mrf.mxu0  ;;  %v656_v45 = vpop.f32.mrf.mxu1 }
 0x10f   :  { %v743_v38 = vmul.f32 %v716_v27, %v695_v33  ;;  %v747_v46 = vmul.f32 %v726_v35, %v699_v34  ;;  %v696_v47 = vadd.f32 %v1419_v24, %v672_v36  ;;  %v700_v48 = vadd.f32 %v1419_v24, %v676_v39 }
 0x110   :  { %v673_v49 = vadd.f32 %v646_v44, %v466_v40  ;;  %v677_v50 = vadd.f32 %v656_v45, %v476_v42  ;;  %v648_v51 = vpop.f32.mrf.mxu0  ;;  %v658_v53 = vpop.f32.mrf.mxu1 }
 0x111   :  { %v744_v56 = vmul.f32 %v716_v27, %v696_v47  ;;  %v748_v57 = vmul.f32 %v726_v35, %v700_v48  ;;  %v674_v61 = vadd.f32 %v648_v51, %v468_v41  ;;  %v678_v62 = vadd.f32 %v658_v53, %v478_v43 }
 0x112   :  { %v697_v59 = vadd.f32 %v1417_v21, %v673_v49  ;;  %v701_v60 = vadd.f32 %v1417_v21, %v677_v50  ;;  %v662_v63 = vpop.f32.mrf.mxu1  ;;  %v783_v0 = vmul.f32 %v743_v38, %v743_v38  ;;  %v787_v1 = vmul.f32 %v747_v46, %v747_v46 }
 0x113   :  { %v766_v2 = vsel %vm258_vm0, %v744_v56, 0.0  ;;  %v784_v3 = vmul.f32 %v744_v56, %v744_v56  ;;  %v698_v7 = vadd.f32 %v1419_v24, %v674_v61  ;;  %v702_v8 = vadd.f32 %v1419_v24, %v678_v62 }
 0x114   :  { %v745_v5 = vmul.f32 %v721_v58, %v697_v59  ;;  %v749_v6 = vmul.f32 %v731_v4, %v701_v60  ;;  %v664_v9 = vpop.f32.mrf.mxu1  ;;  %v769_v10 = vsel %vm258_vm0, %v748_v57, 0.0  ;;  %v788_v12 = vmul.f32 %v748_v57, %v748_v57 }
 0x115   :  { %v679_v13 = vadd.f32 %v662_v63, %v482_v32  ;;  %v680_v14 = vadd.f32 %v664_v9, %v484_v37  ;;  %v806_v15 = vsel %vm258_vm0, %v784_v3, 0.0  ;;  %v746_v18 = vmul.f32 %v721_v58, %v698_v7 }
 0x116   :  { %v755_v16 = vadd.f32 %v745_v5, %v743_v38  ;;  %v785_v17 = vmul.f32 %v745_v5, %v745_v5  ;;  %v666_v19 = vpop.f32.mrf.mxu1  ;;  %v789_v20 = vmul.f32 %v749_v6, %v749_v6  ;;  %v750_v22 = vmul.f32 %v731_v4, %v702_v8 }
 0x117   :  { %v703_v23 = vadd.f32 %v1417_v21, %v679_v13  ;;  %v704_v25 = vadd.f32 %v1419_v24, %v680_v14  ;;  %v767_v29 = vsel %vm258_vm0, %v746_v18, 0.0  ;;  %v786_v30 = vmul.f32 %v746_v18, %v746_v18 }
 0x118   :  { %v795_v26 = vadd.f32 %v785_v17, %v783_v0  ;;  %v756_v27 = vadd.f32 %v755_v16, %v747_v46  ;;  %v768_v31 = vadd.f32 %v767_v29, %v766_v2  ;;  %v790_v33 = vmul.f32 %v750_v22, %v750_v22  ;;  %v668_v42 = vpop.f32.mrf.mxu1 }
 0x119   :  { %v751_v34 = vmul.f32 %v736_v28, %v703_v23  ;;  %v681_v35 = vadd.f32 %v666_v19, %v486_v54  ;;  %v807_v40 = vsel %vm258_vm0, %v786_v30, 0.0  ;;  %v752_v41 = vmul.f32 %v736_v28, %v704_v25  ;;  %v741_v54 = vpop.permute.xlu1 %740 }
 0x11a   :  { %v757_v36 = vadd.f32 %v756_v27, %v749_v6  ;;  %v796_v39 = vadd.f32 %v795_v26, %v787_v1  ;;  %v809_v43 = vsel %vm258_vm0, %v788_v12, 0.0  ;;  %v808_v44 = vadd.f32 %v807_v40, %v806_v15 }
 0x11b   :  { %v770_v45 = vadd.f32 %v769_v10, %v768_v31  ;;  %v771_v38 = vsel %vm258_vm0, %v750_v22, 0.0  ;;  %v791_v48 = vmul.f32 %v751_v34, %v751_v34  ;;  %v792_v32 = vmul.f32 %v752_v41, %v752_v41 }
 0x11c   :  { %v797_v46 = vadd.f32 %v796_v39, %v789_v20  ;;  %v758_v47 = vadd.f32 %v757_v36, %v751_v34  ;;  %v810_v49 = vadd.f32 %v809_v43, %v808_v44  ;;  %v705_v50 = vadd.f32 %v1417_v21, %v681_v35  ;;  %v834_v43 = vld [vmem:[%s1459_s4] sm:$0xf] }
 0x11d   :  { %v772_v37 = vadd.f32 %v771_v38, %v770_v45  ;;  %v682_v51 = vadd.f32 %v668_v42, %v488_v55  ;;  %v811_v53 = vsel %vm258_vm0, %v790_v33, 0.0  ;;  %v773_v56 = vsel %vm258_vm0, %v752_v41, 0.0 }
 0x11e   :  { %v812_v57 = vadd.f32 %v811_v53, %v810_v49  ;;  %v798_v58 = vadd.f32 %v797_v46, %v791_v48  ;;  %v753_v59 = vmul.f32 %v741_v54, %v705_v50  ;;  %v813_v62 = vsel %vm258_vm0, %v792_v32, 0.0 }
 0x11f   :  { %v706_v60 = vadd.f32 %v1419_v24, %v682_v51  ;;  %v774_v61 = vadd.f32 %v773_v56, %v772_v37  ;;  %v1075_v20 = vmov 1983009808  }
 0x120   :  { %v759_v63 = vadd.f32 %v758_v47, %v753_v59  ;;  %v793_v0 = vmul.f32 %v753_v59, %v753_v59  ;;  %v814_v2 = vadd.f32 %v813_v62, %v812_v57  ;;  %v839_v22 = vunpack.c.l.s4 %v1075_v20 }
 0x121   :  { %v754_v1 = vmul.f32 %v741_v54, %v706_v60 }
 0x122   :  { %v760_v3 = vrot.slane %v759_v63, 4  ;;  %v799_v21 = vadd.f32 %v798_v58, %v793_v0  ;;  %v840_v30 = vunpack.c.0.s8 %v839_v22 }
 0x123   :  { %v775_v55 = vsel %vm258_vm0, %v754_v1, 0.0  ;;  %v794_v4 = vmul.f32 %v754_v1, %v754_v1 }
 0x124   :  { %v776_v5 = vadd.f32 %v775_v55, %v774_v61  ;;  %v761_v6 = vadd.f32 %v760_v3, %v759_v63  ;;  %v800_v7 = vrot.slane %v799_v21, 4  ;;  %v843_v39 = vsub.s32 %v840_v30, %v1410_v11 }
 0x125   :  { %v815_v8 = vsel %vm258_vm0, %v794_v4, 0.0 }
 0x126   :  { %v777_v9 = vrot.slane %v776_v5, 4  ;;  %v816_v10 = vadd.f32 %v815_v8, %v814_v2  ;;  %v762_v24 = vrot.slane %v761_v6, 2  ;;  %v801_v12 = vadd.f32 %v800_v7, %v799_v21 }
 0x128   :  { %v778_v13 = vadd.f32 %v777_v9, %v776_v5  ;;  %v817_v14 = vrot.slane %v816_v10, 4  ;;  %v802_v15 = vrot.slane %v801_v12, 2  ;;  %v763_v16 = vadd.f32 %v762_v24, %v761_v6 }
 0x12a   :  { %v779_v17 = vrot.slane %v778_v13, 2  ;;  %v818_v18 = vadd.f32 %v817_v14, %v816_v10  ;;  %v803_v19 = vadd.f32 %v802_v15, %v801_v12  ;;  %v764_v27 = vrot.slane %v763_v16, 1 }
 0x12c   :  { %v780_v23 = vadd.f32 %v779_v17, %v778_v13  ;;  %v819_v25 = vrot.slane %v818_v18, 2  ;;  %v804_v26 = vrot.slane %v803_v19, 1  ;;  %v765_v34 = vadd.f32 %v764_v27, %v763_v16 }
 0x12e   :  { %v781_v28 = vrot.slane %v780_v23, 1  ;;  %v820_v29 = vadd.f32 %v819_v25, %v818_v18  ;;  %v805_v31 = vadd.f32 %v804_v26, %v803_v19 }
 0x130   :  { %v821_v33 = vrot.slane %v820_v29, 1  ;;  %v782_v35 = vadd.f32 %v781_v28, %v780_v23  ;;  %v824_v40 = vsel %vm99_vm2, %v765_v34, %v805_v31 }
 0x132   :  { %v822_v36 = vadd.f32 %v821_v33, %v820_v29 }
 0x134   :  { %v825_v41 = vsel %vm99_vm2, %v782_v35, %v822_v36 }
 0x135   :  { %v837_v42 = vcombine.low %v824_v40, %v825_v41 }
 0x137   :  { %v844_v44 = vrot.slane %v837_v42, %v843_v39 }
 0x139   :  { %v846_v45 = vadd.f32 %v844_v44, %v834_v43 }
 0x13b   :  { %850 = vst.msk [vmem:[%s1459_s4] sm:$0xf] %vm1401_vm9, %v846_v45 }

// kernel: downsample_layer.7
= control target key start
LH: loop header
LB: loop body
LE: loop exit
PB: predicated region body
PF: predicated region fallthrough
CT: control target
= control target key end

     0   :  { %v1067_v2 = vmov 0   ;;  %vm259_vm0 = vcmask 130048   ;;  %vm49_vm1 = vsmask.f32 256  ;;  %vm100_vm2 = vcmask 1040384   ;;  %s1486_s1 = inlined_call_operand.vmem [shape: bf16[3,144,144], index: 1, kind: input, shape index: {}]   ;;  %s1487_s0 = inlined_call_operand.vmem [shape: bf16[48,144], index: 0, kind: input, shape index: {}]   ;;  %s1488_s3 = inlined_call_operand.vmem [shape: f32[48,1], index: 3, kind: input, shape index: {}]   ;;  %s1489_s2 = inlined_call_operand.vmem [shape: f32[3,144], index: 2, kind: input, shape index: {}]   ;;  %s1490_s4 = inlined_call_operand.vmem [shape: f32[48,144], index: 4, kind: output, shape index: {}]  }
   0x1   :  { %v977_v0 = vld [vmem:[%s1486_s1 + $0x104] ss:$8 sps:$4 sm:$0xff]   ;;  %v979_v1 = vld [vmem:[%s1486_s1 + $0x74] ss:$8 sps:$4 sm:$0xff]   ;;  %976 = vset.pattern.permute.xlu1 %v1067_v2  ;;  %975 = vset.pattern.permute.xlu0 %v1067_v2  ;;  %v981_v3 = vld [vmem:[%s1486_s1 + $0x100] ss:$8 sps:$4 sm:$0xff]  }
   0x2   :  { %266 = vmatprep.subr.bf16.mxu0 %v977_v0  ;;  %v982_v4 = vld [vmem:[%s1486_s1 + $0x70] ss:$8 sps:$4 sm:$0xff]   ;;  %428 = vmatprep.subr.bf16.mxu1 %v979_v1  ;;  %v983_v5 = vld [vmem:[%s1486_s1 + $0xf4] ss:$8 sps:$4 sm:$0xff]   ;;  %v985_v6 = vld [vmem:[%s1486_s1 + $0x64] ss:$8 sps:$4 sm:$0xff]  }
   0x3   :  { %267 = vmatpush1.bf16.msra.mxu0 %v981_v3  ;;  %429 = vmatpush1.bf16.msra.mxu1 %v982_v4  ;;  %v987_v7 = vld [vmem:[%s1486_s1 + $0xf0] ss:$8 sps:$4 sm:$0xff]   ;;  %v988_v8 = vld [vmem:[%s1486_s1 + $0x60] ss:$8 sps:$4 sm:$0xff]   ;;  %v989_v9 = vld [vmem:[%s1486_s1 + $0xe4] ss:$8 sps:$4 sm:$0xff]  }
   0x4   :  { %268 = vmatprep.subr.bf16.mxu0 %v983_v5  ;;  %430 = vmatprep.subr.bf16.mxu1 %v985_v6  ;;  %v991_v10 = vld [vmem:[%s1486_s1 + $0x54] ss:$8 sps:$4 sm:$0xff]   ;;  %v993_v11 = vld [vmem:[%s1486_s1 + $0xe0] ss:$8 sps:$4 sm:$0xff]   ;;  %v994_v12 = vld [vmem:[%s1486_s1 + $0x50] ss:$8 sps:$4 sm:$0xff]  }
   0x5   :  { %v995_v13 = vld [vmem:[%s1486_s1 + $0xd4] ss:$8 sps:$4 sm:$0xff]   ;;  %v997_v14 = vld [vmem:[%s1486_s1 + $0x44] ss:$8 sps:$4 sm:$0xff]   ;;  %v999_v15 = vld [vmem:[%s1486_s1 + $0xd0] ss:$8 sps:$4 sm:$0xff]  }
   0x6   :  { %v1000_v16 = vld [vmem:[%s1486_s1 + $0x40] ss:$8 sps:$4 sm:$0xff]   ;;  %v1001_v17 = vld [vmem:[%s1486_s1 + $0xc4] ss:$8 sps:$4 sm:$0xff]   ;;  %v1003_v18 = vld [vmem:[%s1486_s1 + $0x34] ss:$8 sps:$4 sm:$0xff]  }
   0x7   :  { %269 = vmatpush1.bf16.msra.mxu0 %v987_v7  ;;  %431 = vmatpush1.bf16.msra.mxu1 %v988_v8  ;;  %v1005_v19 = vld [vmem:[%s1486_s1 + $0xc0] ss:$8 sps:$4 sm:$0xff]   ;;  %v1006_v20 = vld [vmem:[%s1486_s1 + $0x30] ss:$8 sps:$4 sm:$0xff]   ;;  %v1007_v21 = vld [vmem:[%s1486_s1 + $0xb4] ss:$8 sps:$4 sm:$0xff]  }
   0x8   :  { %270 = vmatprep.subr.bf16.mxu0 %v989_v9  ;;  %432 = vmatprep.subr.bf16.mxu1 %v991_v10  ;;  %v1009_v22 = vld [vmem:[%s1486_s1 + $0x24] ss:$8 sps:$4 sm:$0xff]   ;;  %v1011_v23 = vld [vmem:[%s1486_s1 + $0xb0] ss:$8 sps:$4 sm:$0xff]   ;;  %v1012_v24 = vld [vmem:[%s1486_s1 + $0x20] ss:$8 sps:$4 sm:$0xff]  }
   0x9   :  { %v1013_v25 = vld [vmem:[%s1486_s1 + $0xa4] ss:$8 sps:$4 sm:$0xff]   ;;  %v1015_v26 = vld [vmem:[%s1486_s1 + $0x14] ss:$8 sps:$4 sm:$0xff]   ;;  %v1017_v27 = vld [vmem:[%s1486_s1 + $0xa0] ss:$8 sps:$4 sm:$0xff]  }
   0xa   :  { %v1018_v28 = vld [vmem:[%s1486_s1 + $0x10] ss:$8 sps:$4 sm:$0xff]   ;;  %v1019_v29 = vld [vmem:[%s1486_s1 + $0x94] ss:$8 sps:$4 sm:$0xff]   ;;  %v1183_v30 = vld [vmem:[%s1487_s0 + $0x4] ss:$8 sps:$4 sm:$0xff]  }
   0xb   :  { %271 = vmatpush1.bf16.msra.mxu0 %v993_v11  ;;  %433 = vmatpush1.bf16.msra.mxu1 %v994_v12  ;;  %v1021_v31 = vld [vmem:[%s1486_s1 + $0x4] ss:$8 sps:$4 sm:$0xff]   ;;  %v1191_v32 = vld [vmem:[%s1487_s0] ss:$8 sps:$4 sm:$0xff]   ;;  %v1023_v33 = vld [vmem:[%s1486_s1 + $0x90] ss:$8 sps:$4 sm:$0xff]  }
   0xc   :  { %272 = vmatprep.subr.bf16.mxu0 %v995_v13  ;;  %434 = vmatprep.subr.bf16.mxu1 %v997_v14  ;;  %v58_v34 = vshrl.u32 %v1183_v30, 16  ;;  %v61_v35 = vshll.u32 %v1183_v30, 16  ;;  %v1024_v36 = vld [vmem:[%s1486_s1] ss:$8 sps:$4 sm:$0xff]   ;;  %v51_v37 = vshrl.u32 %v1191_v32, 16  ;;  %v54_v38 = vshll.u32 %v1191_v32, 16  ;;  %vm1215_vm3 = vmand %vm100_vm2, %vm49_vm1 }
   0xd   :  { %893 = vmatprep.mubr.msk.bf16.mxu0 %vm259_vm0, %v1183_v30  ;;  %v1025_v39 = vld [vmem:[%s1486_s1 + $0x114] ss:$8 sps:$4 sm:$0xff]   ;;  %v1027_v40 = vld [vmem:[%s1486_s1 + $0x84] ss:$8 sps:$4 sm:$0xff]   ;;  %v1029_v44 = vld [vmem:[%s1486_s1 + $0x110] ss:$8 sps:$4 sm:$0xff]  }
   0xe   :  { %v60_v41 = vrot.slane %v58_v34, 7  ;;  %v53_v43 = vrot.slane %v51_v37, 7  ;;  %v1030_v46 = vld [vmem:[%s1486_s1 + $0x80] ss:$8 sps:$4 sm:$0xff]   ;;  %v1236_v49 = vld [vmem:[%s1487_s0 + $0x14] ss:$8 sps:$4 sm:$0xff]  }
   0xf   :  { %273 = vmatpush1.bf16.msra.mxu0 %v999_v15  ;;  %435 = vmatpush1.bf16.msra.mxu1 %v1000_v16  ;;  %v1241_v50 = vld [vmem:[%s1487_s0 + $0x10] ss:$8 sps:$4 sm:$0xff]   ;;  %v1036_v51 = vld [vmem:[%s1486_s1 + $0x194] ss:$8 sps:$4 sm:$0xff]   ;;  %v73_v52 = vshrl.u32 %v1236_v49, 16  ;;  %v76_v53 = vshll.u32 %v1236_v49, 16 }
  0x10   :  { %274 = vmatprep.subr.bf16.mxu0 %v1001_v17  ;;  %436 = vmatprep.subr.bf16.mxu1 %v1003_v18  ;;  %v63_v45 = vor.u32 %v61_v35, %v60_v41  ;;  %v56_v47 = vor.u32 %v54_v38, %v53_v43  ;;  %v65_v54 = vshrl.u32 %v1241_v50, 16  ;;  %v1034_v56 = vld [vmem:[%s1486_s1 + $0x190] ss:$8 sps:$4 sm:$0xff]   ;;  %v68_v57 = vshll.u32 %v1241_v50, 16  ;;  %v1265_v60 = vld [vmem:[%s1487_s0 + $0x24] ss:$8 sps:$4 sm:$0xff]  }
  0x11   :  { %v75_v58 = vrot.slane %v73_v52, 7  ;;  %v1039_v61 = vld [vmem:[%s1486_s1 + $0x184] ss:$8 sps:$4 sm:$0xff]   ;;  %v1273_v62 = vld [vmem:[%s1487_s0 + $0x20] ss:$8 sps:$4 sm:$0xff]   ;;  %v89_v0 = vshrl.u32 %v1265_v60, 16 }
  0x12   :  { %v103_v48 = vsel %vm1215_vm3, 0, %v63_v45  ;;  %v102_v55 = vsel %vm1215_vm3, 0, %v56_v47  ;;  %v1260_v59 = vrot.slane %v65_v54, 7  ;;  %v92_v1 = vshll.u32 %v1265_v60, 16  ;;  %v1037_v2 = vld [vmem:[%s1486_s1 + $0x180] ss:$8 sps:$4 sm:$0xff]  }
  0x13   :  { %275 = vmatpush1.bf16.msra.mxu0 %v1005_v19  ;;  %437 = vmatpush1.bf16.msra.mxu1 %v1006_v20  ;;  %v78_v63 = vor.u32 %v76_v53, %v75_v58  ;;  %v91_v5 = vrot.slane %v89_v0, 7  ;;  %v81_v6 = vshrl.u32 %v1273_v62, 16  ;;  %v1042_v7 = vld [vmem:[%s1486_s1 + $0x174] ss:$8 sps:$4 sm:$0xff]   ;;  %v787_v10 = vld [vmem:[%s1488_s3] sm:$0xff]  ;;  %v84_v14 = vshll.u32 %v1273_v62, 16 }
  0x14   :  { %276 = vmatprep.subr.bf16.mxu0 %v1007_v21  ;;  %438 = vmatprep.subr.bf16.mxu1 %v1009_v22  ;;  %v70_v4 = vor.u32 %v68_v57, %v1260_v59  ;;  %v789_v8 = vld [vmem:[%s1488_s3 + $0x10] sm:$0xff]  ;;  %v1045_v15 = vld [vmem:[%s1486_s1 + $0x164] ss:$8 sps:$4 sm:$0xff]   ;;  %v109_v16 = vrot.slane %v61_v35, 1  ;;  %v111_v18 = vrot.slane %v76_v53, 1  ;;  %v790_v21 = vld [vmem:[%s1488_s3 + $0x18] sm:$0xff] }
  0x15   :  { %914 = vmatprep.mubr.msk.bf16.mxu1 %vm259_vm0, %v103_v48  ;;  %v79_v3 = vsel %vm49_vm1, %v60_v41, %v78_v63  ;;  %v94_v9 = vor.u32 %v92_v1, %v91_v5  ;;  %805 = vperm.xlu1 %976, %v789_v8   ;;  %v1040_v11 = vld [vmem:[%s1486_s1 + $0x170] ss:$8 sps:$4 sm:$0xff]   ;;  %v83_v13 = vrot.slane %v81_v6, 7  ;;  %v1043_v19 = vld [vmem:[%s1486_s1 + $0x160] ss:$8 sps:$4 sm:$0xff]   ;;  %v105_v41 = vrot.slane %v54_v38, 1 }
  0x16   :  { %v71_v12 = vsel %vm49_vm1, %v53_v43, %v70_v4  ;;  %795 = vperm.xlu0 %975, %v787_v10   ;;  %v788_v22 = vld [vmem:[%s1488_s3 + $0x8] sm:$0xff]  ;;  %vm104_vm4 = vsmask.f32 7424  ;;  %v791_v35 = vld [vmem:[%s1488_s3 + $0x20] sm:$0xff]  ;;  %v107_v43 = vrot.slane %v68_v57, 1  ;;  %vm125_vm5 = vcmask 1047552  }
  0x17   :  { %277 = vmatpush1.bf16.msra.mxu0 %v1011_v23  ;;  %439 = vmatpush1.bf16.msra.mxu1 %v1012_v24  ;;  %v95_v17 = vsel %vm49_vm1, %v75_v58, %v94_v9  ;;  %v86_v20 = vor.u32 %v84_v14, %v83_v13  ;;  %v1051_v23 = vld [vmem:[%s1486_s1 + $0x154] ss:$8 sps:$4 sm:$0xff]   ;;  %v110_v24 = vor.u32 %v109_v16, %v58_v34  ;;  %v792_v34 = vld [vmem:[%s1488_s3 + $0x28] sm:$0xff]  ;;  %v114_v47 = vrot.slane %v84_v14, 1  ;;  %vm126_vm6 = vmand %vm125_vm5, %vm104_vm4 }
  0x18   :  { %278 = vmatprep.subr.bf16.mxu0 %v1013_v25  ;;  %440 = vmatprep.subr.bf16.mxu1 %v1015_v26  ;;  %v116_v25 = vor.u32 %v111_v18, %v73_v52  ;;  %v117_v26 = vrot.slane %v92_v1, 1  ;;  %v1061_v42 = vld [vmem:[%s1486_s1 + $0x120] ss:$8 sps:$4 sm:$0xff]   ;;  %v106_v45 = vor.u32 %v105_v41, %v51_v37 }
  0x19   :  { %810 = vperm.xlu1 %976, %v790_v21   ;;  %v112_v30 = vsel %vm104_vm4, %v110_v24, %v111_v18  ;;  %v1064_v38 = vld [vmem:[%s1486_s1 + $0x1a0] ss:$8 sps:$4 sm:$0xff]  }
  0x1a   :  { %800 = vperm.xlu0 %975, %v788_v22   ;;  %v120_v48 = vor.u32 %v117_v26, %v89_v0 }
  0x1b   :  { %279 = vmatpush1.bf16.msra.mxu0 %v1017_v27  ;;  %441 = vmatpush1.bf16.msra.mxu1 %v1018_v28  ;;  %v1049_v27 = vld [vmem:[%s1486_s1 + $0x150] ss:$8 sps:$4 sm:$0xff]   ;;  %v87_v28 = vsel %vm49_vm1, %v1260_v59, %v86_v20 }
  0x1c   :  { %280 = vmatprep.subr.bf16.mxu0 %v1019_v29  ;;  %442 = vmatprep.subr.bf16.mxu1 %v1021_v31  ;;  %v1054_v29 = vld [vmem:[%s1486_s1 + $0x144] ss:$8 sps:$4 sm:$0xff]   ;;  %v118_v31 = vsel %vm104_vm4, %v116_v25, %v117_v26 }
  0x1d   :  { %820 = vperm.xlu1 %976, %v792_v34  }
  0x1e   :  { %815 = vperm.xlu0 %975, %v791_v35  }
  0x1f   :  { %281 = vmatpush1.bf16.msra.mxu0 %v1023_v33  ;;  %443 = vmatpush1.bf16.msra.mxu1 %v1024_v36  ;;  %v1052_v33 = vld [vmem:[%s1486_s1 + $0x140] ss:$8 sps:$4 sm:$0xff]   ;;  %v1060_v36 = vld [vmem:[%s1486_s1 + $0x134] ss:$8 sps:$4 sm:$0xff]  }
  0x20   :  { %296 = vmatprep.subr.bf16.mxu0 %v1025_v39  ;;  %458 = vmatprep.subr.bf16.mxu1 %v1027_v40  ;;  %v1058_v39 = vld [vmem:[%s1486_s1 + $0x130] ss:$8 sps:$4 sm:$0xff]   ;;  %v1063_v40 = vld [vmem:[%s1486_s1 + $0x124] ss:$8 sps:$4 sm:$0xff]  }
  0x23   :  { %297 = vmatpush2.bf16.msra.mxu0 %v1029_v44  ;;  %459 = vmatpush2.bf16.msra.mxu1 %v1030_v46  ;;  %v1066_v44 = vld [vmem:[%s1486_s1 + $0x1a4] ss:$8 sps:$4 sm:$0xff]   ;;  %v113_v46 = vor.u32 %v107_v43, %v65_v54 }
  0x24   :  { %609 = vmatprep.subr.bf16.mxu0 %v1036_v51  ;;  %956 = vmatprep.subr.bf16.mxu1 %v1036_v51 }
  0x25   :  { %v115_v37 = vsel %vm104_vm4, %v113_v46, %v114_v47 }
  0x26   :  { %299 = vmatmul.mubr.bf16.vlgmr.msra.gmra.mxu0 %v1191_v32  ;;  %461 = vmatmul.mubr.bf16.vlgmr.msra.gmra.mxu1 %v102_v55  ;;  %v108_v32 = vsel %vm104_vm4, %v106_v45, %v107_v43 }
  0x27   :  { %610 = vmatpush1.bf16.msra.mxu0 %v1034_v56  ;;  %965 = vmatpush1.bf16.msra.mxu1 %v1034_v56 }
  0x28   :  { %611 = vmatprep.subr.bf16.mxu0 %v1039_v61  ;;  %957 = vmatprep.subr.bf16.mxu1 %v1039_v61 }
  0x29   :  { %894 = vmatprep.mubr.msk.bf16.mxu0 %vm259_vm0, %v1236_v49  ;;  %915 = vmatprep.mubr.msk.bf16.mxu1 %vm259_vm0, %v79_v3  ;;  %v128_v49 = vsel %vm126_vm6, %v120_v48, 0 }
  0x2b   :  { %612 = vmatpush1.bf16.msra.mxu0 %v1037_v2  ;;  %966 = vmatpush1.bf16.msra.mxu1 %v1037_v2 }
  0x2c   :  { %613 = vmatprep.subr.bf16.mxu0 %v1042_v7  ;;  %958 = vmatprep.subr.bf16.mxu1 %v1042_v7 }
  0x2e   :  { %309 = vmatmul.mubr.bf16.gmra.mxu0 %v1241_v50  ;;  %471 = vmatmul.mubr.bf16.gmra.mxu1 %v71_v12  ;;  %v119_v50 = vor.u32 %v114_v47, %v81_v6 }
  0x2f   :  { %614 = vmatpush1.bf16.msra.mxu0 %v1040_v11  ;;  %967 = vmatpush1.bf16.msra.mxu1 %v1040_v11  ;;  %v18_v11 = vld [vmem:[%s1489_s2] sm:$0x77] }
  0x30   :  { %615 = vmatprep.subr.bf16.mxu0 %v1045_v15  ;;  %959 = vmatprep.subr.bf16.mxu1 %v1045_v15  ;;  %v127_v51 = vsel %vm126_vm6, %v119_v50, 0 }
  0x31   :  { %895 = vmatprep.mubr.msk.bf16.mxu0 %vm259_vm0, %v1265_v60  ;;  %916 = vmatprep.mubr.msk.bf16.mxu1 %vm259_vm0, %v95_v17 }
  0x33   :  { %616 = vmatpush1.bf16.msra.mxu0 %v1043_v19  ;;  %968 = vmatpush1.bf16.msra.mxu1 %v1043_v19 }
  0x34   :  { %617 = vmatprep.subr.bf16.mxu0 %v1051_v23  ;;  %960 = vmatprep.subr.bf16.mxu1 %v1051_v23 }
  0x36   :  { %319 = vmatmul.mubr.bf16.gmra.mxu0 %v1273_v62  ;;  %481 = vmatmul.mubr.bf16.gmra.mxu1 %v87_v28  ;;  %v685_v62 = vlaneseq }
  0x37   :  { %618 = vmatpush1.bf16.msra.mxu0 %v1049_v27  ;;  %969 = vmatpush1.bf16.msra.mxu1 %v1049_v27 }
  0x38   :  { %619 = vmatprep.subr.bf16.mxu0 %v1054_v29  ;;  %961 = vmatprep.subr.bf16.mxu1 %v1054_v29  ;;  %v686_v7 = vshrl.u32 %v685_v62, 7 }
  0x39   :  { %953 = vmatprep.mubr.msk.bf16.mxu0 %vm259_vm0, %v112_v30  ;;  %954 = vmatprep.mubr.msk.bf16.mxu1 %vm259_vm0, %v118_v31 }
  0x3a   :  { %v687_v10 = vsub.s32 0, %v686_v7  ;;  %v717_v12 = vsub.s32 1, %v686_v7  ;;  %v691_v13 = vsub.s32 4, %v686_v7  ;;  %v721_v14 = vsub.s32 5, %v686_v7 }
  0x3b   :  { %620 = vmatpush1.bf16.msra.mxu0 %v1052_v33  ;;  %970 = vmatpush1.bf16.msra.mxu1 %v1052_v33  ;;  %v747_v17 = vsub.s32 2, %v686_v7  ;;  %v751_v18 = vsub.s32 6, %v686_v7 }
  0x3c   :  { %621 = vmatprep.subr.bf16.mxu0 %v1060_v36  ;;  %962 = vmatprep.subr.bf16.mxu1 %v1060_v36  ;;  %v688_v19 = vrot.slane %v18_v11, %v687_v10  ;;  %v718_v20 = vrot.slane %v18_v11, %v717_v12  ;;  %v692_v21 = vrot.slane %v18_v11, %v691_v13 }
  0x3d   :  { %v722_v22 = vrot.slane %v18_v11, %v721_v14  ;;  %v748_v25 = vrot.slane %v18_v11, %v747_v17  ;;  %v752_v26 = vrot.slane %v18_v11, %v751_v18 }
  0x3e   :  { %v1396_v29 = vrot.slane %v688_v19, %v687_v10  ;;  %v1398_v31 = vrot.slane %v718_v20, %v717_v12  ;;  %v1400_v34 = vrot.slane %v692_v21, %v687_v10 }
  0x3f   :  { %622 = vmatpush1.bf16.msra.mxu0 %v1058_v39  ;;  %971 = vmatpush1.bf16.msra.mxu1 %v1058_v39  ;;  %v1402_v35 = vrot.slane %v722_v22, %v717_v12  ;;  %v1406_v46 = vrot.slane %v752_v26, %v747_v17 }
  0x40   :  { %623 = vmatprep.subr.bf16.mxu0 %v1063_v40  ;;  %963 = vmatprep.subr.bf16.mxu1 %v1063_v40 }
  0x43   :  { %624 = vmatpush1.bf16.msra.mxu0 %v1061_v42  ;;  %972 = vmatpush1.bf16.msra.mxu1 %v1061_v42 }
  0x44   :  { %639 = vmatprep.subr.bf16.mxu0 %v1066_v44  ;;  %964 = vmatprep.subr.bf16.mxu1 %v1066_v44 }
  0x47   :  { %640 = vmatpush2.bf16.msra.mxu0 %v1064_v38  ;;  %973 = vmatpush2.bf16.msra.mxu1 %v1064_v38  ;;  %v1404_v38 = vrot.slane %v748_v25, %v747_v17 }
  0x4a   :  { %642 = vmatmul.mubr.bf16.vlgmr.msra.gmra.mxu0 %v108_v32  ;;  %652 = vmatmul.mubr.bf16.vlgmr.msra.gmra.mxu1 %v115_v37 }
  0x4b   :  { %955 = vmatprep.mubr.msk.bf16.mxu1 %vm259_vm0, %v128_v49 }
  0x52   :  { %662 = vmatmul.mubr.bf16.gmra.mxu1 %v127_v51 }
  0x90   :  { %v806_v17 = vpop.permute.xlu1 %805 }
  0x91   :  { %v796_v13 = vpop.permute.xlu0 %795 }
  0xe6   :  { %v300_v52 = vpop.f32.mrf.mxu0  ;;  %v462_v53 = vpop.f32.mrf.mxu1 }
  0xe7   :  { %v463_v27 = vadd.f32 %v462_v53, %v300_v52 }
  0xe8   :  { %v302_v54 = vpop.f32.mrf.mxu0  ;;  %v464_v55 = vpop.f32.mrf.mxu1 }
  0xe9   :  { %v465_v36 = vadd.f32 %v464_v55, %v302_v54 }
  0xea   :  { %v304_v56 = vpop.f32.mrf.mxu0  ;;  %v466_v57 = vpop.f32.mrf.mxu1 }
  0xeb   :  { %v467_v42 = vadd.f32 %v466_v57, %v304_v56 }
  0xec   :  { %v306_v58 = vpop.f32.mrf.mxu0  ;;  %v468_v59 = vpop.f32.mrf.mxu1 }
  0xed   :  { %v469_v43 = vadd.f32 %v468_v59, %v306_v58 }
  0xee   :  { %v310_v60 = vpop.f32.mrf.mxu0  ;;  %v472_v61 = vpop.f32.mrf.mxu1 }
  0xef   :  { %v473_v28 = vadd.f32 %v472_v61, %v310_v60 }
  0xf0   :  { %v312_v63 = vpop.f32.mrf.mxu0  ;;  %v474_v0 = vpop.f32.mrf.mxu1 }
  0xf1   :  { %v475_v39 = vadd.f32 %v474_v0, %v312_v63 }
  0xf2   :  { %v314_v1 = vpop.f32.mrf.mxu0  ;;  %v476_v2 = vpop.f32.mrf.mxu1 }
  0xf3   :  { %v477_v49 = vadd.f32 %v476_v2, %v314_v1 }
  0xf4   :  { %v316_v3 = vpop.f32.mrf.mxu0  ;;  %v478_v4 = vpop.f32.mrf.mxu1 }
  0xf5   :  { %v479_v50 = vadd.f32 %v478_v4, %v316_v3 }
  0xf6   :  { %v320_v5 = vpop.f32.mrf.mxu0  ;;  %v482_v6 = vpop.f32.mrf.mxu1 }
  0xf7   :  { %v483_v51 = vadd.f32 %v482_v6, %v320_v5 }
  0xf8   :  { %v322_v8 = vpop.f32.mrf.mxu0  ;;  %v484_v9 = vpop.f32.mrf.mxu1 }
  0xf9   :  { %v485_v52 = vadd.f32 %v484_v9, %v322_v8 }
  0xfa   :  { %v324_v15 = vpop.f32.mrf.mxu0  ;;  %v486_v16 = vpop.f32.mrf.mxu1 }
  0xfb   :  { %v487_v59 = vadd.f32 %v486_v16, %v324_v15 }
  0xfc   :  { %v326_v23 = vpop.f32.mrf.mxu0  ;;  %v488_v24 = vpop.f32.mrf.mxu1 }
  0xfd   :  { %v489_v60 = vadd.f32 %v488_v24, %v326_v23 }
 0x10a   :  { %v643_v30 = vpop.f32.mrf.mxu0  ;;  %v653_v33 = vpop.f32.mrf.mxu1 }
 0x10b   :  { %v672_v40 = vadd.f32 %v643_v30, %v463_v27  ;;  %v676_v41 = vadd.f32 %v653_v33, %v473_v28 }
 0x10c   :  { %v645_v44 = vpop.f32.mrf.mxu0  ;;  %v655_v45 = vpop.f32.mrf.mxu1 }
 0x10d   :  { %v703_v47 = vadd.f32 %v1396_v29, %v672_v40  ;;  %v707_v48 = vadd.f32 %v1396_v29, %v676_v41  ;;  %v673_v32 = vadd.f32 %v645_v44, %v465_v36  ;;  %v677_v37 = vadd.f32 %v655_v45, %v475_v39 }
 0x10e   :  { %v647_v53 = vpop.f32.mrf.mxu0  ;;  %v657_v54 = vpop.f32.mrf.mxu1 }
 0x10f   :  { %v733_v55 = vmul.f32 %v1398_v31, %v703_v47  ;;  %v737_v56 = vmul.f32 %v1398_v31, %v707_v48  ;;  %v704_v57 = vadd.f32 %v1400_v34, %v673_v32  ;;  %v708_v58 = vadd.f32 %v1400_v34, %v677_v37  ;;  %v801_v32 = vpop.permute.xlu0 %800 }
 0x110   :  { %v674_v61 = vadd.f32 %v647_v53, %v467_v42  ;;  %v678_v63 = vadd.f32 %v657_v54, %v477_v49  ;;  %v649_v0 = vpop.f32.mrf.mxu0  ;;  %v659_v62 = vpop.f32.mrf.mxu1 }
 0x111   :  { %v734_v1 = vmul.f32 %v1402_v35, %v704_v57  ;;  %v738_v2 = vmul.f32 %v1402_v35, %v708_v58  ;;  %v675_v3 = vadd.f32 %v649_v0, %v469_v43  ;;  %v679_v4 = vadd.f32 %v659_v62, %v479_v50 }
 0x112   :  { %v705_v5 = vadd.f32 %v1396_v29, %v674_v61  ;;  %v709_v6 = vadd.f32 %v1396_v29, %v678_v63  ;;  %v767_v7 = vadd.f32 %v1404_v38, %v737_v56  ;;  %v763_v8 = vadd.f32 %v1404_v38, %v733_v55  ;;  %v663_v9 = vpop.f32.mrf.mxu1 }
 0x113   :  { %v706_v10 = vadd.f32 %v1400_v34, %v675_v3  ;;  %v710_v11 = vadd.f32 %v1400_v34, %v679_v4  ;;  %v768_v12 = vadd.f32 %v1406_v46, %v738_v2  ;;  %v764_v14 = vadd.f32 %v1406_v46, %v734_v1  ;;  %v816_v3 = vpop.permute.xlu0 %815 }
 0x114   :  { %v735_v15 = vmul.f32 %v1398_v31, %v705_v5  ;;  %v739_v16 = vmul.f32 %v1398_v31, %v709_v6  ;;  %v779_v18 = vmax.f32 %v767_v7, 0.0  ;;  %v775_v19 = vmax.f32 %v763_v8, 0.0  ;;  %v665_v20 = vpop.f32.mrf.mxu1 }
 0x115   :  { %v736_v21 = vmul.f32 %v1402_v35, %v706_v10  ;;  %v740_v22 = vmul.f32 %v1402_v35, %v710_v11  ;;  %v780_v23 = vmax.f32 %v768_v12, 0.0  ;;  %v776_v24 = vmax.f32 %v764_v14, 0.0 }
 0x116   :  { %v827_v25 = vmul.f32 %v806_v17, %v779_v18  ;;  %v823_v26 = vmul.f32 %v796_v13, %v775_v19  ;;  %v680_v27 = vadd.f32 %v663_v9, %v483_v51  ;;  %v681_v28 = vadd.f32 %v665_v20, %v485_v52  ;;  %v667_v30 = vpop.f32.mrf.mxu1  ;;  %v811_v52 = vpop.permute.xlu1 %810 }
 0x117   :  { %v828_v33 = vmul.f32 %v806_v17, %v780_v23  ;;  %v824_v36 = vmul.f32 %v796_v13, %v776_v24  ;;  %v769_v39 = vadd.f32 %v1404_v38, %v739_v16  ;;  %v770_v40 = vadd.f32 %v1406_v46, %v740_v22 }
 0x118   :  { %839 = vst [vmem:[%s1490_s4 + $0x20] sm:$0xff] %v827_v25  ;;  %835 = vst [vmem:[%s1490_s4] sm:$0xff] %v823_v26  ;;  %v711_v41 = vadd.f32 %v1396_v29, %v680_v27  ;;  %v712_v42 = vadd.f32 %v1400_v34, %v681_v28  ;;  %v765_v43 = vadd.f32 %v1404_v38, %v735_v15  ;;  %v669_v45 = vpop.f32.mrf.mxu1 }
 0x119   :  { %v766_v44 = vadd.f32 %v1406_v46, %v736_v21  ;;  %840 = vst.msk [vmem:[%s1490_s4 + $0x28] sm:$0xff] %vm259_vm0, %v828_v33  ;;  %836 = vst.msk [vmem:[%s1490_s4 + $0x8] sm:$0xff] %vm259_vm0, %v824_v36  ;;  %v781_v47 = vmax.f32 %v769_v39, 0.0  ;;  %v782_v48 = vmax.f32 %v770_v40, 0.0  ;;  %v682_v37 = vadd.f32 %v667_v30, %v487_v59 }
 0x11a   :  { %v683_v49 = vadd.f32 %v669_v45, %v489_v60  ;;  %v741_v50 = vmul.f32 %v1398_v31, %v711_v41  ;;  %v742_v51 = vmul.f32 %v1402_v35, %v712_v42  ;;  %v777_v53 = vmax.f32 %v765_v43, 0.0  ;;  %v821_v6 = vpop.permute.xlu1 %820 }
 0x11b   :  { %v778_v54 = vmax.f32 %v766_v44, 0.0  ;;  %v829_v55 = vmul.f32 %v811_v52, %v781_v47  ;;  %v830_v56 = vmul.f32 %v811_v52, %v782_v48  ;;  %v713_v57 = vadd.f32 %v1396_v29, %v682_v37 }
 0x11c   :  { %v714_v58 = vadd.f32 %v1400_v34, %v683_v49  ;;  %v825_v61 = vmul.f32 %v801_v32, %v777_v53  ;;  %v771_v0 = vadd.f32 %v1404_v38, %v741_v50  ;;  %v772_v59 = vadd.f32 %v1406_v46, %v742_v51 }
 0x11d   :  { %v826_v63 = vmul.f32 %v801_v32, %v778_v54  ;;  %841 = vst [vmem:[%s1490_s4 + $0x30] sm:$0xff] %v829_v55  ;;  %842 = vst.msk [vmem:[%s1490_s4 + $0x38] sm:$0xff] %vm259_vm0, %v830_v56  ;;  %v743_v60 = vmul.f32 %v1398_v31, %v713_v57 }
 0x11e   :  { %v744_v29 = vmul.f32 %v1402_v35, %v714_v58  ;;  %837 = vst [vmem:[%s1490_s4 + $0x10] sm:$0xff] %v825_v61  ;;  %v783_v34 = vmax.f32 %v771_v0, 0.0  ;;  %v784_v62 = vmax.f32 %v772_v59, 0.0 }
 0x11f   :  { %838 = vst.msk [vmem:[%s1490_s4 + $0x18] sm:$0xff] %vm259_vm0, %v826_v63  ;;  %v773_v1 = vadd.f32 %v1404_v38, %v743_v60 }
 0x120   :  { %v774_v2 = vadd.f32 %v1406_v46, %v744_v29  ;;  %v831_v4 = vmul.f32 %v816_v3, %v783_v34  ;;  %v832_v31 = vmul.f32 %v816_v3, %v784_v62 }
 0x121   :  { %v785_v5 = vmax.f32 %v773_v1, 0.0 }
 0x122   :  { %v786_v35 = vmax.f32 %v774_v2, 0.0  ;;  %843 = vst [vmem:[%s1490_s4 + $0x40] sm:$0xff] %v831_v4  ;;  %844 = vst.msk [vmem:[%s1490_s4 + $0x48] sm:$0xff] %vm259_vm0, %v832_v31 }
 0x123   :  { %v833_v7 = vmul.f32 %v821_v6, %v785_v5 }
 0x124   :  { %v834_v8 = vmul.f32 %v821_v6, %v786_v35 }
 0x125   :  { %845 = vst [vmem:[%s1490_s4 + $0x50] sm:$0xff] %v833_v7 }
 0x126   :  { %846 = vst.msk [vmem:[%s1490_s4 + $0x58] sm:$0xff] %vm259_vm0, %v834_v8 }

</bundles_post_ra>
